<compile_context>
chip_gen: v7x
topology: tpu7x:2x2x1
jax: 0.10.0
libtpu: 0.0.40
codegen_flags: <defaults>
</compile_context>

<pallas_src>
import functools
import math

import jax
import jax.numpy as jnp
from jax import lax
from jax.experimental import pallas as pl
from jax.experimental.pallas import tpu as pltpu


# ----------------------------------------------------------------------------
# helpers
# ----------------------------------------------------------------------------
def _vmem_limit_bytes():
    """Generation-aware scoped-VMEM budget (None -> compiler default)."""
    try:
        cap = int(pltpu.get_tpu_info().vmem_capacity_bytes)
        return int(cap * 3 // 4)
    except Exception:
        return None


_VMEM_LIMIT = _vmem_limit_bytes()


def _mosaic_params(dimension_semantics):
    return pltpu.CompilerParams(
        dimension_semantics=dimension_semantics,
        vmem_limit_bytes=_VMEM_LIMIT,
    )


def _row_tile(m, target=256):
    """Row (sublane) tile: multiple of 8 that divides m, <= target, and (when
    possible) leaves >= 2 grid steps so both v7x TensorCores get work."""
    if m < 16 or m % 8 != 0:
        return m
    cap = min(target, m // 2)
    cap = max(8, (cap // 8) * 8)
    t = cap
    while t >= 8:
        if m % t == 0:
            return t
        t -= 8
    return m


def _col_tile(dim, target=512):
    """Lane tile: multiple of 128 (preferably 256) dividing dim, <= target.
    Large lane dims (vocab, 3D, 4D) are padded / chosen as multiples of 256 at
    init so this never falls back to the whole dimension."""
    if dim <= target:
        return dim
    for align in (256, 128):
        t = (target // align) * align
        while t >= align:
            if dim % t == 0:
                return t
            t -= align
    return dim


_GELU_C = 0.7978845608028654  # sqrt(2/pi)


def _gelu_new(x):
    return 0.5 * x * (1.0 + jnp.tanh(_GELU_C * (x + 0.044715 * (x * x * x))))


def _apply_act(y, act):
    if act == "gelu":
        return _gelu_new(y)
    if act == "tanh":
        return jnp.tanh(y)
    return y


# ----------------------------------------------------------------------------
# Kernel 1: tiled linear  y = act(x @ w + b) [+ residual]
#   K-grid axis (+ f32 accumulator) only when K > 1024; otherwise single shot.
# ----------------------------------------------------------------------------
def _linear_kernel(*refs, act, has_bias, has_res):
    x_ref, w_ref = refs[0], refs[1]
    idx = 2
    if has_bias:
        b_ref = refs[idx]
        idx += 1
    if has_res:
        r_ref = refs[idx]
        idx += 1
    o_ref = refs[idx]

    y = jnp.dot(x_ref[...], w_ref[...], preferred_element_type=jnp.float32)
    if has_bias:
        y = y + b_ref[...]
    y = _apply_act(y, act)
    if has_res:
        y = y + r_ref[...].astype(jnp.float32)
    o_ref[...] = y.astype(o_ref.dtype)


def _linear_red_kernel(*refs, act, has_bias, has_res):
    x_ref, w_ref = refs[0], refs[1]
    idx = 2
    if has_bias:
        b_ref = refs[idx]
        idx += 1
    if has_res:
        r_ref = refs[idx]
        idx += 1
    o_ref = refs[idx]
    acc_ref = refs[idx + 1]

    k = pl.program_id(2)

    @pl.when(k == 0)
    def _init():
        acc_ref[...] = jnp.zeros_like(acc_ref)

    acc_ref[...] += jnp.dot(x_ref[...], w_ref[...],
                            preferred_element_type=jnp.float32)

    @pl.when(k == pl.num_programs(2) - 1)
    def _finalize():
        y = acc_ref[...]
        if has_bias:
            y = y + b_ref[...]
        y = _apply_act(y, act)
        if has_res:
            y = y + r_ref[...].astype(jnp.float32)
        o_ref[...] = y.astype(o_ref.dtype)


def linear_tiled(x, w, bias=None, residual=None, act="none",
                 out_dtype=jnp.bfloat16):
    """x:(M,K), w:(K,N).  bf16 operands on the MXU, f32 accumulation."""
    M, K = x.shape
    K2, N = w.shape
    assert K == K2
    tm = _row_tile(M)
    tn = _col_tile(N)
    has_bias = bias is not None
    has_res = residual is not None
    use_k_grid = K > 1024
    tk = _col_tile(K) if use_k_grid else K

    x = x.astype(jnp.bfloat16)
    w = w.astype(jnp.bfloat16)

    if use_k_grid:
        grid = (M // tm, N // tn, K // tk)
        in_specs = [pl.BlockSpec((tm, tk), lambda i, j, k: (i, k)),
                    pl.BlockSpec((tk, tn), lambda i, j, k: (k, j))]
        args = [x, w]
        if has_bias:
            in_specs.append(pl.BlockSpec((1, tn), lambda i, j, k: (0, j)))
            args.append(bias.reshape(1, N).astype(jnp.float32))
        if has_res:
            in_specs.append(pl.BlockSpec((tm, tn), lambda i, j, k: (i, j)))
            args.append(residual.astype(jnp.bfloat16))
        out_spec = pl.BlockSpec((tm, tn), lambda i, j, k: (i, j))
        scratch = [pltpu.VMEM((tm, tn), jnp.float32)]
        sem = ("parallel", "parallel", "arbitrary")
        kern = functools.partial(_linear_red_kernel, act=act,
                                 has_bias=has_bias, has_res=has_res)
    else:
        grid = (M // tm, N // tn)
        in_specs = [pl.BlockSpec((tm, K), lambda i, j: (i, 0)),
                    pl.BlockSpec((K, tn), lambda i, j: (0, j))]
        args = [x, w]
        if has_bias:
            in_specs.append(pl.BlockSpec((1, tn), lambda i, j: (0, j)))
            args.append(bias.reshape(1, N).astype(jnp.float32))
        if has_res:
            in_specs.append(pl.BlockSpec((tm, tn), lambda i, j: (i, j)))
            args.append(residual.astype(jnp.bfloat16))
        out_spec = pl.BlockSpec((tm, tn), lambda i, j: (i, j))
        scratch = []
        sem = ("parallel", "parallel")
        kern = functools.partial(_linear_kernel, act=act,
                                 has_bias=has_bias, has_res=has_res)

    cost = pl.CostEstimate(
        flops=2 * M * N * K,
        transcendentals=(M * N if act in ("gelu", "tanh") else 0),
        bytes_accessed=(M * K + K * N + M * N) * 2
        + (N * 4 if has_bias else 0) + (M * N * 2 if has_res else 0),
    )
    return pl.pallas_call(
        kern,
        out_shape=jax.ShapeDtypeStruct((M, N), out_dtype),
        grid=grid,
        in_specs=in_specs,
        out_specs=out_spec,
        scratch_shapes=scratch,
        compiler_params=_mosaic_params(sem),
        cost_estimate=cost,
    )(*args)


# ----------------------------------------------------------------------------
# Kernel 2: fused LayerNorm + linear  y = act(LN(x) @ W + b)
#   K (= d_model) kept whole per block so LN stats see the full row.
#   W is always (K, N) -- the tied lm_head weight is pre-transposed once at
#   init, so there is no in-kernel transpose on the biggest matmul.
# ----------------------------------------------------------------------------
def _ln_linear_kernel(*refs, eps, act, has_bias):
    x_ref, g_ref, b_ref, w_ref = refs[0], refs[1], refs[2], refs[3]
    idx = 4
    if has_bias:
        wb_ref = refs[idx]
        idx += 1
    o_ref = refs[idx]

    x = x_ref[...].astype(jnp.float32)               # (tm, K)
    mu = jnp.mean(x, axis=-1, keepdims=True)
    xc = x - mu
    var = jnp.mean(xc * xc, axis=-1, keepdims=True)
    xn = xc * lax.rsqrt(var + eps) * g_ref[...] + b_ref[...]

    y = jnp.dot(xn.astype(jnp.bfloat16), w_ref[...],
                preferred_element_type=jnp.float32)
    if has_bias:
        y = y + wb_ref[...]
    y = _apply_act(y, act)
    o_ref[...] = y.astype(o_ref.dtype)


def ln_linear(x, gamma, beta, w, bias=None, act="none", eps=1e-5,
              out_dtype=jnp.bfloat16):
    M, K = x.shape
    K2, N = w.shape
    assert K == K2
    tm = _row_tile(M)
    tn = _col_tile(N)
    grid = (M // tm, N // tn)

    in_specs = [
        pl.BlockSpec((tm, K), lambda i, j: (i, 0)),
        pl.BlockSpec((1, K), lambda i, j: (0, 0)),
        pl.BlockSpec((1, K), lambda i, j: (0, 0)),
        pl.BlockSpec((K, tn), lambda i, j: (0, j)),
    ]
    args = [x.astype(jnp.bfloat16),
            gamma.reshape(1, K).astype(jnp.float32),
            beta.reshape(1, K).astype(jnp.float32),
            w.astype(jnp.bfloat16)]
    if bias is not None:
        in_specs.append(pl.BlockSpec((1, tn), lambda i, j: (0, j)))
        args.append(bias.reshape(1, N).astype(jnp.float32))

    cost = pl.CostEstimate(
        flops=2 * M * N * K + 8 * M * K,
        transcendentals=(M * N if act in ("gelu", "tanh") else 0),
        bytes_accessed=(M * K + K * N + M * N) * 2,
    )
    return pl.pallas_call(
        functools.partial(_ln_linear_kernel, eps=eps, act=act,
                          has_bias=bias is not None),
        out_shape=jax.ShapeDtypeStruct((M, N), out_dtype),
        grid=grid,
        in_specs=in_specs,
        out_specs=pl.BlockSpec((tm, tn), lambda i, j: (i, j)),
        compiler_params=_mosaic_params(("parallel", "parallel")),
        cost_estimate=cost,
    )(*args)


# ----------------------------------------------------------------------------
# Kernel 3: fused MLP block  out = x + (gelu_new(LN(x) @ Wfc + bfc) @ Wp + bp)
#   The H4 (= 4*D) axis is a grid reduction axis so only (D, th)/(th, D)
#   weight slabs are ever resident in VMEM; the LN'd input is cached in a
#   bf16 VMEM scratch at h==0 and the gelu slab never touches HBM.
# ----------------------------------------------------------------------------
def _mlp_kernel(x_ref, g_ref, b_ref, fcw_ref, fcb_ref, pw_ref, pb_ref, o_ref,
                xn_ref, acc_ref, *, eps):
    h = pl.program_id(1)

    @pl.when(h == 0)
    def _init():
        x = x_ref[...].astype(jnp.float32)
        mu = jnp.mean(x, axis=-1, keepdims=True)
        xc = x - mu
        var = jnp.mean(xc * xc, axis=-1, keepdims=True)
        xn = xc * lax.rsqrt(var + eps) * g_ref[...] + b_ref[...]
        xn_ref[...] = xn.astype(jnp.bfloat16)
        acc_ref[...] = jnp.zeros_like(acc_ref)

    hh = jnp.dot(xn_ref[...], fcw_ref[...], preferred_element_type=jnp.float32)
    hh = _gelu_new(hh + fcb_ref[...])                # (tm, th) f32, VMEM only
    acc_ref[...] += jnp.dot(hh.astype(jnp.bfloat16), pw_ref[...],
                            preferred_element_type=jnp.float32)

    @pl.when(h == pl.num_programs(1) - 1)
    def _finalize():
        y = acc_ref[...] + pb_ref[...] + x_ref[...].astype(jnp.float32)
        o_ref[...] = y.astype(o_ref.dtype)


def mlp_block(x, gamma, beta, fc_w, fc_b, proj_w, proj_b, eps=1e-5,
              out_dtype=jnp.bfloat16):
    M, D = x.shape
    D2, H4 = fc_w.shape
    assert D == D2 and proj_w.shape == (H4, D)
    tm = _row_tile(M, target=256)
    th = _col_tile(H4)
    grid = (M // tm, H4 // th)

    cost = pl.CostEstimate(
        flops=4 * M * D * H4 + 8 * M * D,
        transcendentals=M * H4,
        bytes_accessed=(2 * M * D + 2 * D * H4) * 2 + (H4 + 3 * D) * 4,
    )
    return pl.pallas_call(
        functools.partial(_mlp_kernel, eps=eps),
        out_shape=jax.ShapeDtypeStruct((M, D), out_dtype),
        grid=grid,
        in_specs=[
            pl.BlockSpec((tm, D), lambda i, h: (i, 0)),
            pl.BlockSpec((1, D), lambda i, h: (0, 0)),
            pl.BlockSpec((1, D), lambda i, h: (0, 0)),
            pl.BlockSpec((D, th), lambda i, h: (0, h)),
            pl.BlockSpec((1, th), lambda i, h: (0, h)),
            pl.BlockSpec((th, D), lambda i, h: (h, 0)),
            pl.BlockSpec((1, D), lambda i, h: (0, 0)),
        ],
        out_specs=pl.BlockSpec((tm, D), lambda i, h: (i, 0)),
        scratch_shapes=[pltpu.VMEM((tm, D), jnp.bfloat16),
                        pltpu.VMEM((tm, D), jnp.float32)],
        compiler_params=_mosaic_params(("parallel", "arbitrary")),
        cost_estimate=cost,
    )(x.astype(jnp.bfloat16),
      gamma.reshape(1, D).astype(jnp.float32),
      beta.reshape(1, D).astype(jnp.float32),
      fc_w.astype(jnp.bfloat16),
      fc_b.reshape(1, H4).astype(jnp.float32),
      proj_w.astype(jnp.bfloat16),
      proj_b.reshape(1, D).astype(jnp.float32))


# ----------------------------------------------------------------------------
# Kernel 4: causal multi-head attention, one batch element per grid step.
#   Lane-dense (T, 3D) bf16 input block and a single lane-dense (T, D) store.
#   Softmax in f32; per-head work kept fully in-kernel (no wrapper transposes).
# ----------------------------------------------------------------------------
def _attn_kernel(qkv_ref, o_ref, *, n_head, scale):
    qkv = qkv_ref[0]                                 # (T, 3D) bf16
    T = qkv.shape[0]
    D = qkv.shape[1] // 3
    Dh = D // n_head

    row = lax.broadcasted_iota(jnp.int32, (T, T), 0)
    col = lax.broadcasted_iota(jnp.int32, (T, T), 1)
    causal = col <= row
    neg = jnp.float32(-1e30)

    outs = []
    for h in range(n_head):
        qh = qkv[:, h * Dh:(h + 1) * Dh]
        kh = qkv[:, D + h * Dh:D + (h + 1) * Dh]
        vh = qkv[:, 2 * D + h * Dh:2 * D + (h + 1) * Dh]
        # q . k^T without materializing a transpose: contract the Dh axes.
        s = lax.dot_general(qh, kh, (((1,), (1,)), ((), ())),
                            preferred_element_type=jnp.float32) * scale
        s = jnp.where(causal, s, neg)
        s = s - jnp.max(s, axis=-1, keepdims=True)
        p = jnp.exp(s)
        p = p * pl.reciprocal(jnp.sum(p, axis=-1, keepdims=True), approx=True)
        outs.append(jnp.dot(p.astype(jnp.bfloat16), vh,
                            preferred_element_type=jnp.float32))  # (T, Dh)
    o_ref[0] = jnp.concatenate(outs, axis=-1).astype(o_ref.dtype)


def causal_attention(qkv, n_head, out_dtype=jnp.bfloat16):
    """qkv: (B, T, 3D) -> (B, T, D), causal softmax attention."""
    B, T, D3 = qkv.shape
    D = D3 // 3
    Dh = D // n_head
    scale = 1.0 / math.sqrt(Dh)
    return pl.pallas_call(
        functools.partial(_attn_kernel, n_head=n_head, scale=scale),
        out_shape=jax.ShapeDtypeStruct((B, T, D), out_dtype),
        grid=(B,),
        in_specs=[pl.BlockSpec((1, T, D3), lambda b: (b, 0, 0))],
        out_specs=pl.BlockSpec((1, T, D), lambda b: (b, 0, 0)),
        compiler_params=_mosaic_params(("parallel",)),
    )(qkv.astype(jnp.bfloat16))


# ----------------------------------------------------------------------------
# Parameter construction (deterministic, synthetic GPT-2 config).
# Matmul weights stored bf16; LN params / biases / wpe in f32.
# The tied lm_head weight is a one-time padded transpose of wte -> (D, Vpad),
# lane-dense and padded to a multiple of 256 so the lm_head always tiles.
# ----------------------------------------------------------------------------
def init_params(key, *, vocab, n_pos, d_model, n_layer, n_head, prefix_size):
    keys = iter(jax.random.split(key, 8 + 12 * n_layer))

    def nrm(shape, std=0.02, dtype=jnp.bfloat16):
        return (jax.random.normal(next(keys), shape, jnp.float32) * std).astype(dtype)

    wte = nrm((vocab, d_model))
    vocab_pad = ((vocab + 255) // 256) * 256
    lm_head_w = jnp.pad(wte.astype(jnp.float32),
                        ((0, vocab_pad - vocab), (0, 0))).T.astype(jnp.bfloat16)

    p = {
        "wte": wte,                                          # (V, D) bf16 (embedding)
        "lm_head_w": lm_head_w,                              # (D, Vpad) bf16 (tied head)
        "wpe": nrm((n_pos, d_model), 0.01, jnp.float32),
        # clip_project = MLP((prefix_size, d_model)) -> single Linear with bias
        "clip_w": nrm((prefix_size, d_model)),
        "clip_b": nrm((d_model,), 0.01, jnp.float32),
        "ln_f_g": jnp.ones((d_model,), jnp.float32),
        "ln_f_b": jnp.zeros((d_model,), jnp.float32),
        "layers": [],
    }
    for _ in range(n_layer):
        p["layers"].append({
            "ln1_g": jnp.ones((d_model,), jnp.float32),
            "ln1_b": jnp.zeros((d_model,), jnp.float32),
            "attn_w": nrm((d_model, 3 * d_model)),
            "attn_b": nrm((3 * d_model,), 0.01, jnp.float32),
            "proj_w": nrm((d_model, d_model)),
            "proj_b": nrm((d_model,), 0.01, jnp.float32),
            "ln2_g": jnp.ones((d_model,), jnp.float32),
            "ln2_b": jnp.zeros((d_model,), jnp.float32),
            "fc_w": nrm((d_model, 4 * d_model)),
            "fc_b": nrm((4 * d_model,), 0.01, jnp.float32),
            "mlp_proj_w": nrm((4 * d_model, d_model)),
            "mlp_proj_b": nrm((d_model,), 0.01, jnp.float32),
        })
    return p


# ----------------------------------------------------------------------------
# DeCap forward
# ----------------------------------------------------------------------------
def decap_forward(params, clip_features, gpt_tokens, *, n_head):
    """clip_features: (B, prefix_size) f32 ; gpt_tokens: (B, Tt) int32.

    Returns logits of shape (B, 1 + Tt, vocab), matching
    GPT2LMHeadModel(inputs_embeds=cat([clip_proj, wte(tokens)], dim=1)).logits.
    """
    B, Tt = gpt_tokens.shape
    vocab, D = params["wte"].shape

    # clip_project (single Linear; no activation since MLP has only 2 sizes)
    emb_clip = linear_tiled(clip_features, params["clip_w"], params["clip_b"])

    # token embedding lookup (gather; no clean Pallas tiling -> plain JAX)
    emb_text = jnp.take(params["wte"], gpt_tokens, axis=0)

    h = jnp.concatenate([emb_clip[:, None, :], emb_text], axis=1)   # (B, T, D)
    T = Tt + 1
    x = (h.astype(jnp.float32) + params["wpe"][:T][None]).astype(jnp.bfloat16)

    M = B * T
    x = x.reshape(M, D)                                             # bf16 residual stream
    for lyr in params["layers"]:
        # attention block: fused ln1 + QKV, lane-dense attention,
        # output projection with fused residual add
        qkv = ln_linear(x, lyr["ln1_g"], lyr["ln1_b"],
                        lyr["attn_w"], lyr["attn_b"])               # (M, 3D) bf16
        a = causal_attention(qkv.reshape(B, T, 3 * D), n_head)      # (B, T, D) bf16
        x = linear_tiled(a.reshape(M, D), lyr["proj_w"], lyr["proj_b"],
                         residual=x)                                # (M, D) bf16

        # MLP block: fused ln2 + fc + gelu_new + proj + residual, H4-tiled
        x = mlp_block(x, lyr["ln2_g"], lyr["ln2_b"],
                      lyr["fc_w"], lyr["fc_b"],
                      lyr["mlp_proj_w"], lyr["mlp_proj_b"])         # (M, D) bf16

    # final LN fused into tied lm_head (pre-transposed, vocab-padded weight)
    logits = ln_linear(x, params["ln_f_g"], params["ln_f_b"],
                       params["lm_head_w"], bias=None,
                       out_dtype=jnp.float32)                       # (M, Vpad) f32
    return logits.reshape(B, T, -1)[:, :, :vocab]


# ----------------------------------------------------------------------------
if __name__ == "__main__":
    # small synthetic config
    VOCAB = 256
    N_POS = 16
    D_MODEL = 128
    N_LAYER = 2
    N_HEAD = 4
    PREFIX_SIZE = 64

    B = 2
    T_TOKENS = 7  # gpt tokens; clip prefix adds 1 -> total T = 8

    key = jax.random.PRNGKey(0)
    kp, kc, kt = jax.random.split(key, 3)

    params = init_params(
        kp, vocab=VOCAB, n_pos=N_POS, d_model=D_MODEL,
        n_layer=N_LAYER, n_head=N_HEAD, prefix_size=PREFIX_SIZE,
    )

    clip_features = jax.random.normal(kc, (B, PREFIX_SIZE), jnp.float32)
    gpt_tokens = jax.random.randint(kt, (B, T_TOKENS), 0, VOCAB, jnp.int32)

    fwd = jax.jit(functools.partial(decap_forward, n_head=N_HEAD))
    logits = fwd(params, clip_features, gpt_tokens)
    logits = jax.block_until_ready(logits)

    assert logits.shape == (B, T_TOKENS + 1, VOCAB), logits.shape
    assert bool(jnp.all(jnp.isfinite(logits)))
    print("KERNEL_OK")
</pallas_src>

<mosaic_0001>
module attributes {stable_mosaic.version = 11 : i64} {
  func.func @_linear_kernel(%arg0: i32, %arg1: i32, %arg2: memref<2x64xbf16, #tpu.memory_space<vmem>>, %arg3: memref<64x128xbf16, #tpu.memory_space<vmem>>, %arg4: memref<1x128xf32, #tpu.memory_space<vmem>>, %arg5: memref<2x128xbf16, #tpu.memory_space<vmem>>) attributes {dimension_semantics = [#tpu.dimension_semantics<parallel>, #tpu.dimension_semantics<parallel>], iteration_bounds = array<i64: 1, 1>, scalar_prefetch = 0 : i64, scratch_operands = 0 : i64, tpu.core_type = #tpu.core_type<tc>, window_params = [{transform_indices = @transform_0, window_bounds = array<i64: 2, 64>}, {transform_indices = @transform_1, window_bounds = array<i64: 64, 128>}, {transform_indices = @transform_2, window_bounds = array<i64: 1, 128>}, {transform_indices = @transform_3, window_bounds = array<i64: 2, 128>}]} {
    %c0 = arith.constant 0 : index
    %c0_0 = arith.constant 0 : index
    %0 = vector.load %arg2[%c0, %c0_0] : memref<2x64xbf16, #tpu.memory_space<vmem>>, vector<2x64xbf16>
    %c0_1 = arith.constant 0 : index
    %c0_2 = arith.constant 0 : index
    %1 = vector.load %arg3[%c0_1, %c0_2] : memref<64x128xbf16, #tpu.memory_space<vmem>>, vector<64x128xbf16>
    %cst = arith.constant dense<0.000000e+00> : vector<2x128xf32>
    %2 = tpu.matmul %0, %1, %cst {dimension_numbers = #tpu.dot_dimension_numbers<[1], [0], [0], [1], [0, 0, 1, 1], [], []>} : vector<2x64xbf16>, vector<64x128xbf16>, vector<2x128xf32> -> vector<2x128xf32>
    %c0_3 = arith.constant 0 : index
    %c0_4 = arith.constant 0 : index
    %3 = vector.load %arg4[%c0_3, %c0_4] : memref<1x128xf32, #tpu.memory_space<vmem>>, vector<1x128xf32>
    %4 = vector.broadcast %3 : vector<1x128xf32> to vector<2x128xf32>
    %5 = arith.addf %2, %4 : vector<2x128xf32>
    %6 = arith.truncf %5 : vector<2x128xf32> to vector<2x128xbf16>
    %c0_5 = arith.constant 0 : index
    %c0_6 = arith.constant 0 : index
    %7 = vector.load %arg5[%c0_5, %c0_6] : memref<2x128xbf16, #tpu.memory_space<vmem>>, vector<2x128xbf16>
    tpu.vector_store %arg5[%c0_5, %c0_6], %6 {strides = array<i32>} : memref<2x128xbf16, #tpu.memory_space<vmem>>, vector<2x128xbf16>,
    return
  }
  func.func @transform_0(%arg0: i32, %arg1: i32) -> (i32, i32) {
    %c0_i32 = arith.constant 0 : i32
    %c0_i32_0 = arith.constant 0 : i32
    return %arg0, %c0_i32 : i32, i32
  }
  func.func @transform_1(%arg0: i32, %arg1: i32) -> (i32, i32) {
    %c0_i32 = arith.constant 0 : i32
    %c0_i32_0 = arith.constant 0 : i32
    return %c0_i32, %arg1 : i32, i32
  }
  func.func @transform_2(%arg0: i32, %arg1: i32) -> (i32, i32) {
    %c0_i32 = arith.constant 0 : i32
    %c0_i32_0 = arith.constant 0 : i32
    return %c0_i32, %arg1 : i32, i32
  }
  func.func @transform_3(%arg0: i32, %arg1: i32) -> (i32, i32) {
    %c0_i32 = arith.constant 0 : i32
    return %arg0, %arg1 : i32, i32
  }
}

module attributes {stable_mosaic.version = 11 : i64} {
  func.func @_attn_kernel(%arg0: i32, %arg1: memref<1x8x384xbf16, #tpu.memory_space<vmem>>, %arg2: memref<1x8x128xbf16, #tpu.memory_space<vmem>>) attributes {dimension_semantics = [#tpu.dimension_semantics<parallel>], iteration_bounds = array<i64: 2>, scalar_prefetch = 0 : i64, scratch_operands = 0 : i64, tpu.core_type = #tpu.core_type<tc>, window_params = [{transform_indices = @transform_0, window_bounds = array<i64: 1, 8, 384>}, {transform_indices = @transform_1, window_bounds = array<i64: 1, 8, 128>}]} {
    %c0 = arith.constant 0 : index
    %c0_0 = arith.constant 0 : index
    %c0_1 = arith.constant 0 : index
    %0 = vector.load %arg1[%c0, %c0_0, %c0_1] : memref<1x8x384xbf16, #tpu.memory_space<vmem>>, vector<1x8x384xbf16>
    %1 = vector.shape_cast %0 : vector<1x8x384xbf16> to vector<8x384xbf16>
    %2 = tpu.iota {dimensions = array<i32: 0>} : vector<8x8xi32>
    %3 = tpu.iota {dimensions = array<i32: 1>} : vector<8x8xi32>
    %4 = arith.cmpi sle, %3, %2 : vector<8x8xi32>
    %5 = vector.extract_strided_slice %1 {offsets = [0, 0], sizes = [8, 32], strides = [1, 1]} : vector<8x384xbf16> to vector<8x32xbf16>
    %6 = vector.extract_strided_slice %1 {offsets = [0, 128], sizes = [8, 32], strides = [1, 1]} : vector<8x384xbf16> to vector<8x32xbf16>
    %7 = vector.extract_strided_slice %1 {offsets = [0, 256], sizes = [8, 32], strides = [1, 1]} : vector<8x384xbf16> to vector<8x32xbf16>
    %cst = arith.constant dense<0.000000e+00> : vector<8x8xf32>
    %8 = tpu.matmul %5, %6, %cst {dimension_numbers = #tpu.dot_dimension_numbers<[1], [1], [0], [0], [0, 0, 1, 0], [], []>} : vector<8x32xbf16>, vector<8x32xbf16>, vector<8x8xf32> -> vector<8x8xf32>
    %cst_2 = arith.constant 0.176776692 : f32
    %9 = vector.broadcast %cst_2 : f32 to vector<8x8xf32>
    %10 = arith.mulf %8, %9 : vector<8x8xf32>
    %cst_3 = arith.constant -1.000000e+30 : f32
    %11 = vector.broadcast %cst_3 : f32 to vector<8x8xf32>
    %12 = arith.select %4, %10, %11 : vector<8x8xi1>, vector<8x8xf32>
    %cst_4 = arith.constant dense<0xFF800000> : vector<8xf32>
    %13 = vector.multi_reduction <maximumf>, %12, %cst_4 [1] : vector<8x8xf32> to vector<8xf32>
    %14 = vector.shape_cast %13 : vector<8xf32> to vector<8x1xf32>
    %15 = vector.broadcast %14 : vector<8x1xf32> to vector<8x8xf32>
    %16 = arith.subf %12, %15 : vector<8x8xf32>
    %17 = math.exp %16 : vector<8x8xf32>
    %cst_5 = arith.constant dense<0.000000e+00> : vector<8xf32>
    %18 = vector.multi_reduction <add>, %17, %cst_5 [1] : vector<8x8xf32> to vector<8xf32>
    %19 = vector.shape_cast %18 : vector<8xf32> to vector<8x1xf32>
    %20 = tpu.reciprocal %19 {approx = true} : vector<8x1xf32> -> vector<8x1xf32>
    %21 = vector.broadcast %20 : vector<8x1xf32> to vector<8x8xf32>
    %22 = arith.mulf %17, %21 : vector<8x8xf32>
    %23 = arith.truncf %22 : vector<8x8xf32> to vector<8x8xbf16>
    %cst_6 = arith.constant dense<0.000000e+00> : vector<8x32xf32>
    %24 = tpu.matmul %23, %7, %cst_6 {dimension_numbers = #tpu.dot_dimension_numbers<[1], [0], [0], [1], [0, 0, 1, 1], [], []>} : vector<8x8xbf16>, vector<8x32xbf16>, vector<8x32xf32> -> vector<8x32xf32>
    %25 = vector.extract_strided_slice %1 {offsets = [0, 32], sizes = [8, 32], strides = [1, 1]} : vector<8x384xbf16> to vector<8x32xbf16>
    %26 = vector.extract_strided_slice %1 {offsets = [0, 160], sizes = [8, 32], strides = [1, 1]} : vector<8x384xbf16> to vector<8x32xbf16>
    %27 = vector.extract_strided_slice %1 {offsets = [0, 288], sizes = [8, 32], strides = [1, 1]} : vector<8x384xbf16> to vector<8x32xbf16>
    %cst_7 = arith.constant dense<0.000000e+00> : vector<8x8xf32>
    %28 = tpu.matmul %25, %26, %cst_7 {dimension_numbers = #tpu.dot_dimension_numbers<[1], [1], [0], [0], [0, 0, 1, 0], [], []>} : vector<8x32xbf16>, vector<8x32xbf16>, vector<8x8xf32> -> vector<8x8xf32>
    %cst_8 = arith.constant 0.176776692 : f32
    %29 = vector.broadcast %cst_8 : f32 to vector<8x8xf32>
    %30 = arith.mulf %28, %29 : vector<8x8xf32>
    %cst_9 = arith.constant -1.000000e+30 : f32
    %31 = vector.broadcast %cst_9 : f32 to vector<8x8xf32>
    %32 = arith.select %4, %30, %31 : vector<8x8xi1>, vector<8x8xf32>
    %cst_10 = arith.constant dense<0xFF800000> : vector<8xf32>
    %33 = vector.multi_reduction <maximumf>, %32, %cst_10 [1] : vector<8x8xf32> to vector<8xf32>
    %34 = vector.shape_cast %33 : vector<8xf32> to vector<8x1xf32>
    %35 = vector.broadcast %34 : vector<8x1xf32> to vector<8x8xf32>
    %36 = arith.subf %32, %35 : vector<8x8xf32>
    %37 = math.exp %36 : vector<8x8xf32>
    %cst_11 = arith.constant dense<0.000000e+00> : vector<8xf32>
    %38 = vector.multi_reduction <add>, %37, %cst_11 [1] : vector<8x8xf32> to vector<8xf32>
    %39 = vector.shape_cast %38 : vector<8xf32> to vector<8x1xf32>
    %40 = tpu.reciprocal %39 {approx = true} : vector<8x1xf32> -> vector<8x1xf32>
    %41 = vector.broadcast %40 : vector<8x1xf32> to vector<8x8xf32>
    %42 = arith.mulf %37, %41 : vector<8x8xf32>
    %43 = arith.truncf %42 : vector<8x8xf32> to vector<8x8xbf16>
    %cst_12 = arith.constant dense<0.000000e+00> : vector<8x32xf32>
    %44 = tpu.matmul %43, %27, %cst_12 {dimension_numbers = #tpu.dot_dimension_numbers<[1], [0], [0], [1], [0, 0, 1, 1], [], []>} : vector<8x8xbf16>, vector<8x32xbf16>, vector<8x32xf32> -> vector<8x32xf32>
    %45 = vector.extract_strided_slice %1 {offsets = [0, 64], sizes = [8, 32], strides = [1, 1]} : vector<8x384xbf16> to vector<8x32xbf16>
    %46 = vector.extract_strided_slice %1 {offsets = [0, 192], sizes = [8, 32], strides = [1, 1]} : vector<8x384xbf16> to vector<8x32xbf16>
    %47 = vector.extract_strided_slice %1 {offsets = [0, 320], sizes = [8, 32], strides = [1, 1]} : vector<8x384xbf16> to vector<8x32xbf16>
    %cst_13 = arith.constant dense<0.000000e+00> : vector<8x8xf32>
    %48 = tpu.matmul %45, %46, %cst_13 {dimension_numbers = #tpu.dot_dimension_numbers<[1], [1], [0], [0], [0, 0, 1, 0], [], []>} : vector<8x32xbf16>, vector<8x32xbf16>, vector<8x8xf32> -> vector<8x8xf32>
    %cst_14 = arith.constant 0.176776692 : f32
    %49 = vector.broadcast %cst_14 : f32 to vector<8x8xf32>
    %50 = arith.mulf %48, %49 : vector<8x8xf32>
    %cst_15 = arith.constant -1.000000e+30 : f32
    %51 = vector.broadcast %cst_15 : f32 to vector<8x8xf32>
    %52 = arith.select %4, %50, %51 : vector<8x8xi1>, vector<8x8xf32>
    %cst_16 = arith.constant dense<0xFF800000> : vector<8xf32>
    %53 = vector.multi_reduction <maximumf>, %52, %cst_16 [1] : vector<8x8xf32> to vector<8xf32>
    %54 = vector.shape_cast %53 : vector<8xf32> to vector<8x1xf32>
    %55 = vector.broadcast %54 : vector<8x1xf32> to vector<8x8xf32>
    %56 = arith.subf %52, %55 : vector<8x8xf32>
    %57 = math.exp %56 : vector<8x8xf32>
    %cst_17 = arith.constant dense<0.000000e+00> : vector<8xf32>
    %58 = vector.multi_reduction <add>, %57, %cst_17 [1] : vector<8x8xf32> to vector<8xf32>
    %59 = vector.shape_cast %58 : vector<8xf32> to vector<8x1xf32>
    %60 = tpu.reciprocal %59 {approx = true} : vector<8x1xf32> -> vector<8x1xf32>
    %61 = vector.broadcast %60 : vector<8x1xf32> to vector<8x8xf32>
    %62 = arith.mulf %57, %61 : vector<8x8xf32>
    %63 = arith.truncf %62 : vector<8x8xf32> to vector<8x8xbf16>
    %cst_18 = arith.constant dense<0.000000e+00> : vector<8x32xf32>
    %64 = tpu.matmul %63, %47, %cst_18 {dimension_numbers = #tpu.dot_dimension_numbers<[1], [0], [0], [1], [0, 0, 1, 1], [], []>} : vector<8x8xbf16>, vector<8x32xbf16>, vector<8x32xf32> -> vector<8x32xf32>
    %65 = vector.extract_strided_slice %1 {offsets = [0, 96], sizes = [8, 32], strides = [1, 1]} : vector<8x384xbf16> to vector<8x32xbf16>
    %66 = vector.extract_strided_slice %1 {offsets = [0, 224], sizes = [8, 32], strides = [1, 1]} : vector<8x384xbf16> to vector<8x32xbf16>
    %67 = vector.extract_strided_slice %1 {offsets = [0, 352], sizes = [8, 32], strides = [1, 1]} : vector<8x384xbf16> to vector<8x32xbf16>
    %cst_19 = arith.constant dense<0.000000e+00> : vector<8x8xf32>
    %68 = tpu.matmul %65, %66, %cst_19 {dimension_numbers = #tpu.dot_dimension_numbers<[1], [1], [0], [0], [0, 0, 1, 0], [], []>} : vector<8x32xbf16>, vector<8x32xbf16>, vector<8x8xf32> -> vector<8x8xf32>
    %cst_20 = arith.constant 0.176776692 : f32
    %69 = vector.broadcast %cst_20 : f32 to vector<8x8xf32>
    %70 = arith.mulf %68, %69 : vector<8x8xf32>
    %cst_21 = arith.constant -1.000000e+30 : f32
    %71 = vector.broadcast %cst_21 : f32 to vector<8x8xf32>
    %72 = arith.select %4, %70, %71 : vector<8x8xi1>, vector<8x8xf32>
    %cst_22 = arith.constant dense<0xFF800000> : vector<8xf32>
    %73 = vector.multi_reduction <maximumf>, %72, %cst_22 [1] : vector<8x8xf32> to vector<8xf32>
    %74 = vector.shape_cast %73 : vector<8xf32> to vector<8x1xf32>
    %75 = vector.broadcast %74 : vector<8x1xf32> to vector<8x8xf32>
    %76 = arith.subf %72, %75 : vector<8x8xf32>
    %77 = math.exp %76 : vector<8x8xf32>
    %cst_23 = arith.constant dense<0.000000e+00> : vector<8xf32>
    %78 = vector.multi_reduction <add>, %77, %cst_23 [1] : vector<8x8xf32> to vector<8xf32>
    %79 = vector.shape_cast %78 : vector<8xf32> to vector<8x1xf32>
    %80 = tpu.reciprocal %79 {approx = true} : vector<8x1xf32> -> vector<8x1xf32>
    %81 = vector.broadcast %80 : vector<8x1xf32> to vector<8x8xf32>
    %82 = arith.mulf %77, %81 : vector<8x8xf32>
    %83 = arith.truncf %82 : vector<8x8xf32> to vector<8x8xbf16>
    %cst_24 = arith.constant dense<0.000000e+00> : vector<8x32xf32>
    %84 = tpu.matmul %83, %67, %cst_24 {dimension_numbers = #tpu.dot_dimension_numbers<[1], [0], [0], [1], [0, 0, 1, 1], [], []>} : vector<8x8xbf16>, vector<8x32xbf16>, vector<8x32xf32> -> vector<8x32xf32>
    %85 = tpu.concatenate %24, %44, %64, %84 in 1 : vector<8x32xf32>, vector<8x32xf32>, vector<8x32xf32>, vector<8x32xf32> -> vector<8x128xf32>
    %86 = arith.truncf %85 : vector<8x128xf32> to vector<8x128xbf16>
    %c0_25 = arith.constant 0 : index
    %c0_26 = arith.constant 0 : index
    %c0_27 = arith.constant 0 : index
    %87 = vector.load %arg2[%c0_25, %c0_26, %c0_27] : memref<1x8x128xbf16, #tpu.memory_space<vmem>>, vector<1x8x128xbf16>
    %88 = vector.shape_cast %87 : vector<1x8x128xbf16> to vector<8x128xbf16>
    %89 = vector.shape_cast %86 : vector<8x128xbf16> to vector<1x8x128xbf16>
    tpu.vector_store %arg2[%c0_25, %c0_26, %c0_27], %89 {strides = array<i32>} : memref<1x8x128xbf16, #tpu.memory_space<vmem>>, vector<1x8x128xbf16>,
    return
  }
  func.func @transform_0(%arg0: i32) -> (i32, i32, i32) {
    %c0_i32 = arith.constant 0 : i32
    %c0_i32_0 = arith.constant 0 : i32
    %c0_i32_1 = arith.constant 0 : i32
    return %arg0, %c0_i32, %c0_i32_0 : i32, i32, i32
  }
  func.func @transform_1(%arg0: i32) -> (i32, i32, i32) {
    %c0_i32 = arith.constant 0 : i32
    %c0_i32_0 = arith.constant 0 : i32
    %c0_i32_1 = arith.constant 0 : i32
    return %arg0, %c0_i32, %c0_i32_0 : i32, i32, i32
  }
}

module attributes {stable_mosaic.version = 11 : i64} {
  func.func @_ln_linear_kernel(%arg0: i32, %arg1: i32, %arg2: memref<8x128xbf16, #tpu.memory_space<vmem>>, %arg3: memref<1x128xf32, #tpu.memory_space<vmem>>, %arg4: memref<1x128xf32, #tpu.memory_space<vmem>>, %arg5: memref<128x384xbf16, #tpu.memory_space<vmem>>, %arg6: memref<1x384xf32, #tpu.memory_space<vmem>>, %arg7: memref<8x384xbf16, #tpu.memory_space<vmem>>) attributes {dimension_semantics = [#tpu.dimension_semantics<parallel>, #tpu.dimension_semantics<parallel>], iteration_bounds = array<i64: 2, 1>, scalar_prefetch = 0 : i64, scratch_operands = 0 : i64, tpu.core_type = #tpu.core_type<tc>, window_params = [{transform_indices = @transform_0, window_bounds = array<i64: 8, 128>}, {pipeline_mode = #tpu.pipeline_mode<synchronous>, transform_indices = @transform_1, window_bounds = array<i64: 1, 128>}, {pipeline_mode = #tpu.pipeline_mode<synchronous>, transform_indices = @transform_2, window_bounds = array<i64: 1, 128>}, {transform_indices = @transform_3, window_bounds = array<i64: 128, 384>}, {transform_indices = @transform_4, window_bounds = array<i64: 1, 384>}, {transform_indices = @transform_5, window_bounds = array<i64: 8, 384>}]} {
    %c0 = arith.constant 0 : index
    %c0_0 = arith.constant 0 : index
    %0 = vector.load %arg2[%c0, %c0_0] : memref<8x128xbf16, #tpu.memory_space<vmem>>, vector<8x128xbf16>
    %1 = arith.extf %0 : vector<8x128xbf16> to vector<8x128xf32>
    %cst = arith.constant dense<0.000000e+00> : vector<8xf32>
    %2 = vector.multi_reduction <add>, %1, %cst [1] : vector<8x128xf32> to vector<8xf32>
    %3 = vector.shape_cast %2 : vector<8xf32> to vector<8x1xf32>
    %cst_1 = arith.constant 1.280000e+02 : f32
    %4 = vector.broadcast %cst_1 : f32 to vector<8x1xf32>
    %5 = arith.divf %3, %4 : vector<8x1xf32>
    %6 = vector.broadcast %5 : vector<8x1xf32> to vector<8x128xf32>
    %7 = arith.subf %1, %6 : vector<8x128xf32>
    %8 = arith.mulf %7, %7 : vector<8x128xf32>
    %cst_2 = arith.constant dense<0.000000e+00> : vector<8xf32>
    %9 = vector.multi_reduction <add>, %8, %cst_2 [1] : vector<8x128xf32> to vector<8xf32>
    %10 = vector.shape_cast %9 : vector<8xf32> to vector<8x1xf32>
    %cst_3 = arith.constant 1.280000e+02 : f32
    %11 = vector.broadcast %cst_3 : f32 to vector<8x1xf32>
    %12 = arith.divf %10, %11 : vector<8x1xf32>
    %cst_4 = arith.constant 9.99999974E-6 : f32
    %13 = vector.broadcast %cst_4 : f32 to vector<8x1xf32>
    %14 = arith.addf %12, %13 : vector<8x1xf32>
    %15 = math.rsqrt %14 : vector<8x1xf32>
    %16 = vector.broadcast %15 : vector<8x1xf32> to vector<8x128xf32>
    %17 = arith.mulf %7, %16 : vector<8x128xf32>
    %c0_5 = arith.constant 0 : index
    %c0_6 = arith.constant 0 : index
    %18 = vector.load %arg3[%c0_5, %c0_6] : memref<1x128xf32, #tpu.memory_space<vmem>>, vector<1x128xf32>
    %19 = vector.broadcast %18 : vector<1x128xf32> to vector<8x128xf32>
    %20 = arith.mulf %17, %19 : vector<8x128xf32>
    %c0_7 = arith.constant 0 : index
    %c0_8 = arith.constant 0 : index
    %21 = vector.load %arg4[%c0_7, %c0_8] : memref<1x128xf32, #tpu.memory_space<vmem>>, vector<1x128xf32>
    %22 = vector.broadcast %21 : vector<1x128xf32> to vector<8x128xf32>
    %23 = arith.addf %20, %22 : vector<8x128xf32>
    %24 = arith.truncf %23 : vector<8x128xf32> to vector<8x128xbf16>
    %c0_9 = arith.constant 0 : index
    %c0_10 = arith.constant 0 : index
    %25 = vector.load %arg5[%c0_9, %c0_10] : memref<128x384xbf16, #tpu.memory_space<vmem>>, vector<128x384xbf16>
    %cst_11 = arith.constant dense<0.000000e+00> : vector<8x384xf32>
    %26 = tpu.matmul %24, %25, %cst_11 {dimension_numbers = #tpu.dot_dimension_numbers<[1], [0], [0], [1], [0, 0, 1, 1], [], []>} : vector<8x128xbf16>, vector<128x384xbf16>, vector<8x384xf32> -> vector<8x384xf32>
    %c0_12 = arith.constant 0 : index
    %c0_13 = arith.constant 0 : index
    %27 = vector.load %arg6[%c0_12, %c0_13] : memref<1x384xf32, #tpu.memory_space<vmem>>, vector<1x384xf32>
    %28 = vector.broadcast %27 : vector<1x384xf32> to vector<8x384xf32>
    %29 = arith.addf %26, %28 : vector<8x384xf32>
    %30 = arith.truncf %29 : vector<8x384xf32> to vector<8x384xbf16>
    %c0_14 = arith.constant 0 : index
    %c0_15 = arith.constant 0 : index
    %31 = vector.load %arg7[%c0_14, %c0_15] : memref<8x384xbf16, #tpu.memory_space<vmem>>, vector<8x384xbf16>
    tpu.vector_store %arg7[%c0_14, %c0_15], %30 {strides = array<i32>} : memref<8x384xbf16, #tpu.memory_space<vmem>>, vector<8x384xbf16>,
    return
  }
  func.func @transform_0(%arg0: i32, %arg1: i32) -> (i32, i32) {
    %c0_i32 = arith.constant 0 : i32
    %c0_i32_0 = arith.constant 0 : i32
    return %arg0, %c0_i32 : i32, i32
  }
  func.func @transform_1(%arg0: i32, %arg1: i32) -> (i32, i32) {
    %c0_i32 = arith.constant 0 : i32
    %c0_i32_0 = arith.constant 0 : i32
    %c0_i32_1 = arith.constant 0 : i32
    return %c0_i32, %c0_i32_0 : i32, i32
  }
  func.func @transform_2(%arg0: i32, %arg1: i32) -> (i32, i32) {
    %c0_i32 = arith.constant 0 : i32
    %c0_i32_0 = arith.constant 0 : i32
    %c0_i32_1 = arith.constant 0 : i32
    return %c0_i32, %c0_i32_0 : i32, i32
  }
  func.func @transform_3(%arg0: i32, %arg1: i32) -> (i32, i32) {
    %c0_i32 = arith.constant 0 : i32
    %c0_i32_0 = arith.constant 0 : i32
    return %c0_i32, %arg1 : i32, i32
  }
  func.func @transform_4(%arg0: i32, %arg1: i32) -> (i32, i32) {
    %c0_i32 = arith.constant 0 : i32
    %c0_i32_0 = arith.constant 0 : i32
    return %c0_i32, %arg1 : i32, i32
  }
  func.func @transform_5(%arg0: i32, %arg1: i32) -> (i32, i32) {
    %c0_i32 = arith.constant 0 : i32
    return %arg0, %arg1 : i32, i32
  }
}

module attributes {stable_mosaic.version = 11 : i64} {
  func.func @_linear_kernel(%arg0: i32, %arg1: i32, %arg2: memref<8x128xbf16, #tpu.memory_space<vmem>>, %arg3: memref<128x128xbf16, #tpu.memory_space<vmem>>, %arg4: memref<1x128xf32, #tpu.memory_space<vmem>>, %arg5: memref<8x128xbf16, #tpu.memory_space<vmem>>, %arg6: memref<8x128xbf16, #tpu.memory_space<vmem>>) attributes {dimension_semantics = [#tpu.dimension_semantics<parallel>, #tpu.dimension_semantics<parallel>], iteration_bounds = array<i64: 2, 1>, scalar_prefetch = 0 : i64, scratch_operands = 0 : i64, tpu.core_type = #tpu.core_type<tc>, window_params = [{transform_indices = @transform_0, window_bounds = array<i64: 8, 128>}, {transform_indices = @transform_1, window_bounds = array<i64: 128, 128>}, {transform_indices = @transform_2, window_bounds = array<i64: 1, 128>}, {transform_indices = @transform_3, window_bounds = array<i64: 8, 128>}, {transform_indices = @transform_4, window_bounds = array<i64: 8, 128>}]} {
    %c0 = arith.constant 0 : index
    %c0_0 = arith.constant 0 : index
    %0 = vector.load %arg2[%c0, %c0_0] : memref<8x128xbf16, #tpu.memory_space<vmem>>, vector<8x128xbf16>
    %c0_1 = arith.constant 0 : index
    %c0_2 = arith.constant 0 : index
    %1 = vector.load %arg3[%c0_1, %c0_2] : memref<128x128xbf16, #tpu.memory_space<vmem>>, vector<128x128xbf16>
    %cst = arith.constant dense<0.000000e+00> : vector<8x128xf32>
    %2 = tpu.matmul %0, %1, %cst {dimension_numbers = #tpu.dot_dimension_numbers<[1], [0], [0], [1], [0, 0, 1, 1], [], []>} : vector<8x128xbf16>, vector<128x128xbf16>, vector<8x128xf32> -> vector<8x128xf32>
    %c0_3 = arith.constant 0 : index
    %c0_4 = arith.constant 0 : index
    %3 = vector.load %arg4[%c0_3, %c0_4] : memref<1x128xf32, #tpu.memory_space<vmem>>, vector<1x128xf32>
    %4 = vector.broadcast %3 : vector<1x128xf32> to vector<8x128xf32>
    %5 = arith.addf %2, %4 : vector<8x128xf32>
    %c0_5 = arith.constant 0 : index
    %c0_6 = arith.constant 0 : index
    %6 = vector.load %arg5[%c0_5, %c0_6] : memref<8x128xbf16, #tpu.memory_space<vmem>>, vector<8x128xbf16>
    %7 = arith.extf %6 : vector<8x128xbf16> to vector<8x128xf32>
    %8 = arith.addf %5, %7 : vector<8x128xf32>
    %9 = arith.truncf %8 : vector<8x128xf32> to vector<8x128xbf16>
    %c0_7 = arith.constant 0 : index
    %c0_8 = arith.constant 0 : index
    %10 = vector.load %arg6[%c0_7, %c0_8] : memref<8x128xbf16, #tpu.memory_space<vmem>>, vector<8x128xbf16>
    tpu.vector_store %arg6[%c0_7, %c0_8], %9 {strides = array<i32>} : memref<8x128xbf16, #tpu.memory_space<vmem>>, vector<8x128xbf16>,
    return
  }
  func.func @transform_0(%arg0: i32, %arg1: i32) -> (i32, i32) {
    %c0_i32 = arith.constant 0 : i32
    %c0_i32_0 = arith.constant 0 : i32
    return %arg0, %c0_i32 : i32, i32
  }
  func.func @transform_1(%arg0: i32, %arg1: i32) -> (i32, i32) {
    %c0_i32 = arith.constant 0 : i32
    %c0_i32_0 = arith.constant 0 : i32
    return %c0_i32, %arg1 : i32, i32
  }
  func.func @transform_2(%arg0: i32, %arg1: i32) -> (i32, i32) {
    %c0_i32 = arith.constant 0 : i32
    %c0_i32_0 = arith.constant 0 : i32
    return %c0_i32, %arg1 : i32, i32
  }
  func.func @transform_3(%arg0: i32, %arg1: i32) -> (i32, i32) {
    %c0_i32 = arith.constant 0 : i32
    return %arg0, %arg1 : i32, i32
  }
  func.func @transform_4(%arg0: i32, %arg1: i32) -> (i32, i32) {
    %c0_i32 = arith.constant 0 : i32
    return %arg0, %arg1 : i32, i32
  }
}

module attributes {stable_mosaic.version = 11 : i64} {
  func.func @_mlp_kernel(%arg0: i32, %arg1: i32, %arg2: memref<8x128xbf16, #tpu.memory_space<vmem>>, %arg3: memref<1x128xf32, #tpu.memory_space<vmem>>, %arg4: memref<1x128xf32, #tpu.memory_space<vmem>>, %arg5: memref<128x512xbf16, #tpu.memory_space<vmem>>, %arg6: memref<1x512xf32, #tpu.memory_space<vmem>>, %arg7: memref<512x128xbf16, #tpu.memory_space<vmem>>, %arg8: memref<1x128xf32, #tpu.memory_space<vmem>>, %arg9: memref<8x128xbf16, #tpu.memory_space<vmem>>, %arg10: memref<8x128xbf16, #tpu.memory_space<vmem>>, %arg11: memref<8x128xf32, #tpu.memory_space<vmem>>) attributes {dimension_semantics = [#tpu.dimension_semantics<parallel>, #tpu.dimension_semantics<arbitrary>], iteration_bounds = array<i64: 2, 1>, scalar_prefetch = 0 : i64, scratch_operands = 2 : i64, tpu.core_type = #tpu.core_type<tc>, window_params = [{transform_indices = @transform_0, window_bounds = array<i64: 8, 128>}, {pipeline_mode = #tpu.pipeline_mode<synchronous>, transform_indices = @transform_1, window_bounds = array<i64: 1, 128>}, {pipeline_mode = #tpu.pipeline_mode<synchronous>, transform_indices = @transform_2, window_bounds = array<i64: 1, 128>}, {transform_indices = @transform_3, window_bounds = array<i64: 128, 512>}, {transform_indices = @transform_4, window_bounds = array<i64: 1, 512>}, {transform_indices = @transform_5, window_bounds = array<i64: 512, 128>}, {pipeline_mode = #tpu.pipeline_mode<synchronous>, transform_indices = @transform_6, window_bounds = array<i64: 1, 128>}, {transform_indices = @transform_7, window_bounds = array<i64: 8, 128>}]} {
    %c0_i32 = arith.constant 0 : i32
    %0 = arith.cmpi eq, %arg1, %c0_i32 : i32
    %1 = arith.extui %0 : i1 to i32
    %c0_i32_0 = arith.constant 0 : i32
    %2 = arith.cmpi ne, %1, %c0_i32_0 : i32
    scf.if %2 {
      %c0_19 = arith.constant 0 : index
      %c0_20 = arith.constant 0 : index
      %31 = vector.load %arg2[%c0_19, %c0_20] : memref<8x128xbf16, #tpu.memory_space<vmem>>, vector<8x128xbf16>
      %32 = arith.extf %31 : vector<8x128xbf16> to vector<8x128xf32>
      %cst_21 = arith.constant dense<0.000000e+00> : vector<8xf32>
      %33 = vector.multi_reduction <add>, %32, %cst_21 [1] : vector<8x128xf32> to vector<8xf32>
      %34 = vector.shape_cast %33 : vector<8xf32> to vector<8x1xf32>
      %cst_22 = arith.constant 1.280000e+02 : f32
      %35 = vector.broadcast %cst_22 : f32 to vector<8x1xf32>
      %36 = arith.divf %34, %35 : vector<8x1xf32>
      %37 = vector.broadcast %36 : vector<8x1xf32> to vector<8x128xf32>
      %38 = arith.subf %32, %37 : vector<8x128xf32>
      %39 = arith.mulf %38, %38 : vector<8x128xf32>
      %cst_23 = arith.constant dense<0.000000e+00> : vector<8xf32>
      %40 = vector.multi_reduction <add>, %39, %cst_23 [1] : vector<8x128xf32> to vector<8xf32>
      %41 = vector.shape_cast %40 : vector<8xf32> to vector<8x1xf32>
      %cst_24 = arith.constant 1.280000e+02 : f32
      %42 = vector.broadcast %cst_24 : f32 to vector<8x1xf32>
      %43 = arith.divf %41, %42 : vector<8x1xf32>
      %cst_25 = arith.constant 9.99999974E-6 : f32
      %44 = vector.broadcast %cst_25 : f32 to vector<8x1xf32>
      %45 = arith.addf %43, %44 : vector<8x1xf32>
      %46 = math.rsqrt %45 : vector<8x1xf32>
      %47 = vector.broadcast %46 : vector<8x1xf32> to vector<8x128xf32>
      %48 = arith.mulf %38, %47 : vector<8x128xf32>
      %c0_26 = arith.constant 0 : index
      %c0_27 = arith.constant 0 : index
      %49 = vector.load %arg3[%c0_26, %c0_27] : memref<1x128xf32, #tpu.memory_space<vmem>>, vector<1x128xf32>
      %50 = vector.broadcast %49 : vector<1x128xf32> to vector<8x128xf32>
      %51 = arith.mulf %48, %50 : vector<8x128xf32>
      %c0_28 = arith.constant 0 : index
      %c0_29 = arith.constant 0 : index
      %52 = vector.load %arg4[%c0_28, %c0_29] : memref<1x128xf32, #tpu.memory_space<vmem>>, vector<1x128xf32>
      %53 = vector.broadcast %52 : vector<1x128xf32> to vector<8x128xf32>
      %54 = arith.addf %51, %53 : vector<8x128xf32>
      %55 = arith.truncf %54 : vector<8x128xf32> to vector<8x128xbf16>
      %c0_30 = arith.constant 0 : index
      %c0_31 = arith.constant 0 : index
      %56 = vector.load %arg10[%c0_30, %c0_31] : memref<8x128xbf16, #tpu.memory_space<vmem>>, vector<8x128xbf16>
      tpu.vector_store %arg10[%c0_30, %c0_31], %55 {strides = array<i32>} : memref<8x128xbf16, #tpu.memory_space<vmem>>, vector<8x128xbf16>,
      %cst_32 = arith.constant 0.000000e+00 : f32
      %57 = vector.broadcast %cst_32 : f32 to vector<8x128xf32>
      %c0_33 = arith.constant 0 : index
      %c0_34 = arith.constant 0 : index
      %58 = vector.load %arg11[%c0_33, %c0_34] : memref<8x128xf32, #tpu.memory_space<vmem>>, vector<8x128xf32>
      tpu.vector_store %arg11[%c0_33, %c0_34], %57 {strides = array<i32>} : memref<8x128xf32, #tpu.memory_space<vmem>>, vector<8x128xf32>,
    } else {
    }
    %c0 = arith.constant 0 : index
    %c0_1 = arith.constant 0 : index
    %3 = vector.load %arg10[%c0, %c0_1] : memref<8x128xbf16, #tpu.memory_space<vmem>>, vector<8x128xbf16>
    %c0_2 = arith.constant 0 : index
    %c0_3 = arith.constant 0 : index
    %4 = vector.load %arg5[%c0_2, %c0_3] : memref<128x512xbf16, #tpu.memory_space<vmem>>, vector<128x512xbf16>
    %cst = arith.constant dense<0.000000e+00> : vector<8x512xf32>
    %5 = tpu.matmul %3, %4, %cst {dimension_numbers = #tpu.dot_dimension_numbers<[1], [0], [0], [1], [0, 0, 1, 1], [], []>} : vector<8x128xbf16>, vector<128x512xbf16>, vector<8x512xf32> -> vector<8x512xf32>
    %c0_4 = arith.constant 0 : index
    %c0_5 = arith.constant 0 : index
    %6 = vector.load %arg6[%c0_4, %c0_5] : memref<1x512xf32, #tpu.memory_space<vmem>>, vector<1x512xf32>
    %7 = vector.broadcast %6 : vector<1x512xf32> to vector<8x512xf32>
    %8 = arith.addf %5, %7 : vector<8x512xf32>
    %cst_6 = arith.constant 5.000000e-01 : f32
    %9 = vector.broadcast %cst_6 : f32 to vector<8x512xf32>
    %10 = arith.mulf %9, %8 : vector<8x512xf32>
    %11 = arith.mulf %8, %8 : vector<8x512xf32>
    %12 = arith.mulf %11, %8 : vector<8x512xf32>
    %cst_7 = arith.constant 4.471500e-02 : f32
    %13 = vector.broadcast %cst_7 : f32 to vector<8x512xf32>
    %14 = arith.mulf %13, %12 : vector<8x512xf32>
    %15 = arith.addf %8, %14 : vector<8x512xf32>
    %cst_8 = arith.constant 0.797884583 : f32
    %16 = vector.broadcast %cst_8 : f32 to vector<8x512xf32>
    %17 = arith.mulf %16, %15 : vector<8x512xf32>
    %18 = math.tanh %17 : vector<8x512xf32>
    %cst_9 = arith.constant 1.000000e+00 : f32
    %19 = vector.broadcast %cst_9 : f32 to vector<8x512xf32>
    %20 = arith.addf %19, %18 : vector<8x512xf32>
    %21 = arith.mulf %10, %20 : vector<8x512xf32>
    %c0_10 = arith.constant 0 : index
    %c0_11 = arith.constant 0 : index
    %22 = vector.load %arg11[%c0_10, %c0_11] : memref<8x128xf32, #tpu.memory_space<vmem>>, vector<8x128xf32>
    %23 = arith.truncf %21 : vector<8x512xf32> to vector<8x512xbf16>
    %c0_12 = arith.constant 0 : index
    %c0_13 = arith.constant 0 : index
    %24 = vector.load %arg7[%c0_12, %c0_13] : memref<512x128xbf16, #tpu.memory_space<vmem>>, vector<512x128xbf16>
    %cst_14 = arith.constant dense<0.000000e+00> : vector<8x128xf32>
    %25 = tpu.matmul %23, %24, %cst_14 {dimension_numbers = #tpu.dot_dimension_numbers<[1], [0], [0], [1], [0, 0, 1, 1], [], []>} : vector<8x512xbf16>, vector<512x128xbf16>, vector<8x128xf32> -> vector<8x128xf32>
    %26 = arith.addf %22, %25 : vector<8x128xf32>
    %c0_15 = arith.constant 0 : index
    %c0_16 = arith.constant 0 : index
    %27 = vector.load %arg11[%c0_15, %c0_16] : memref<8x128xf32, #tpu.memory_space<vmem>>, vector<8x128xf32>
    tpu.vector_store %arg11[%c0_15, %c0_16], %26 {strides = array<i32>} : memref<8x128xf32, #tpu.memory_space<vmem>>, vector<8x128xf32>,
    %c0_i32_17 = arith.constant 0 : i32
    %28 = arith.cmpi eq, %arg1, %c0_i32_17 : i32
    %29 = arith.extui %28 : i1 to i32
    %c0_i32_18 = arith.constant 0 : i32
    %30 = arith.cmpi ne, %29, %c0_i32_18 : i32
    scf.if %30 {
      %c0_19 = arith.constant 0 : index
      %c0_20 = arith.constant 0 : index
      %31 = vector.load %arg11[%c0_19, %c0_20] : memref<8x128xf32, #tpu.memory_space<vmem>>, vector<8x128xf32>
      %c0_21 = arith.constant 0 : index
      %c0_22 = arith.constant 0 : index
      %32 = vector.load %arg8[%c0_21, %c0_22] : memref<1x128xf32, #tpu.memory_space<vmem>>, vector<1x128xf32>
      %33 = vector.broadcast %32 : vector<1x128xf32> to vector<8x128xf32>
      %34 = arith.addf %31, %33 : vector<8x128xf32>
      %c0_23 = arith.constant 0 : index
      %c0_24 = arith.constant 0 : index
      %35 = vector.load %arg2[%c0_23, %c0_24] : memref<8x128xbf16, #tpu.memory_space<vmem>>, vector<8x128xbf16>
      %36 = arith.extf %35 : vector<8x128xbf16> to vector<8x128xf32>
      %37 = arith.addf %34, %36 : vector<8x128xf32>
      %38 = arith.truncf %37 : vector<8x128xf32> to vector<8x128xbf16>
      %c0_25 = arith.constant 0 : index
      %c0_26 = arith.constant 0 : index
      %39 = vector.load %arg9[%c0_25, %c0_26] : memref<8x128xbf16, #tpu.memory_space<vmem>>, vector<8x128xbf16>
      tpu.vector_store %arg9[%c0_25, %c0_26], %38 {strides = array<i32>} : memref<8x128xbf16, #tpu.memory_space<vmem>>, vector<8x128xbf16>,
    } else {
    }
    return
  }
  func.func @transform_0(%arg0: i32, %arg1: i32) -> (i32, i32) {
    %c0_i32 = arith.constant 0 : i32
    %c0_i32_0 = arith.constant 0 : i32
    return %arg0, %c0_i32 : i32, i32
  }
  func.func @transform_1(%arg0: i32, %arg1: i32) -> (i32, i32) {
    %c0_i32 = arith.constant 0 : i32
    %c0_i32_0 = arith.constant 0 : i32
    %c0_i32_1 = arith.constant 0 : i32
    return %c0_i32, %c0_i32_0 : i32, i32
  }
  func.func @transform_2(%arg0: i32, %arg1: i32) -> (i32, i32) {
    %c0_i32 = arith.constant 0 : i32
    %c0_i32_0 = arith.constant 0 : i32
    %c0_i32_1 = arith.constant 0 : i32
    return %c0_i32, %c0_i32_0 : i32, i32
  }
  func.func @transform_3(%arg0: i32, %arg1: i32) -> (i32, i32) {
    %c0_i32 = arith.constant 0 : i32
    %c0_i32_0 = arith.constant 0 : i32
    return %c0_i32, %arg1 : i32, i32
  }
  func.func @transform_4(%arg0: i32, %arg1: i32) -> (i32, i32) {
    %c0_i32 = arith.constant 0 : i32
    %c0_i32_0 = arith.constant 0 : i32
    return %c0_i32, %arg1 : i32, i32
  }
  func.func @transform_5(%arg0: i32, %arg1: i32) -> (i32, i32) {
    %c0_i32 = arith.constant 0 : i32
    %c0_i32_0 = arith.constant 0 : i32
    return %arg1, %c0_i32 : i32, i32
  }
  func.func @transform_6(%arg0: i32, %arg1: i32) -> (i32, i32) {
    %c0_i32 = arith.constant 0 : i32
    %c0_i32_0 = arith.constant 0 : i32
    %c0_i32_1 = arith.constant 0 : i32
    return %c0_i32, %c0_i32_0 : i32, i32
  }
  func.func @transform_7(%arg0: i32, %arg1: i32) -> (i32, i32) {
    %c0_i32 = arith.constant 0 : i32
    %c0_i32_0 = arith.constant 0 : i32
    return %arg0, %c0_i32 : i32, i32
  }
}

module attributes {stable_mosaic.version = 11 : i64} {
  func.func @_ln_linear_kernel(%arg0: i32, %arg1: i32, %arg2: memref<8x128xbf16, #tpu.memory_space<vmem>>, %arg3: memref<1x128xf32, #tpu.memory_space<vmem>>, %arg4: memref<1x128xf32, #tpu.memory_space<vmem>>, %arg5: memref<128x384xbf16, #tpu.memory_space<vmem>>, %arg6: memref<1x384xf32, #tpu.memory_space<vmem>>, %arg7: memref<8x384xbf16, #tpu.memory_space<vmem>>) attributes {dimension_semantics = [#tpu.dimension_semantics<parallel>, #tpu.dimension_semantics<parallel>], iteration_bounds = array<i64: 2, 1>, scalar_prefetch = 0 : i64, scratch_operands = 0 : i64, tpu.core_type = #tpu.core_type<tc>, window_params = [{transform_indices = @transform_0, window_bounds = array<i64: 8, 128>}, {pipeline_mode = #tpu.pipeline_mode<synchronous>, transform_indices = @transform_1, window_bounds = array<i64: 1, 128>}, {pipeline_mode = #tpu.pipeline_mode<synchronous>, transform_indices = @transform_2, window_bounds = array<i64: 1, 128>}, {transform_indices = @transform_3, window_bounds = array<i64: 128, 384>}, {transform_indices = @transform_4, window_bounds = array<i64: 1, 384>}, {transform_indices = @transform_5, window_bounds = array<i64: 8, 384>}]} {
    %c0 = arith.constant 0 : index
    %c0_0 = arith.constant 0 : index
    %0 = vector.load %arg2[%c0, %c0_0] : memref<8x128xbf16, #tpu.memory_space<vmem>>, vector<8x128xbf16>
    %1 = arith.extf %0 : vector<8x128xbf16> to vector<8x128xf32>
    %cst = arith.constant dense<0.000000e+00> : vector<8xf32>
    %2 = vector.multi_reduction <add>, %1, %cst [1] : vector<8x128xf32> to vector<8xf32>
    %3 = vector.shape_cast %2 : vector<8xf32> to vector<8x1xf32>
    %cst_1 = arith.constant 1.280000e+02 : f32
    %4 = vector.broadcast %cst_1 : f32 to vector<8x1xf32>
    %5 = arith.divf %3, %4 : vector<8x1xf32>
    %6 = vector.broadcast %5 : vector<8x1xf32> to vector<8x128xf32>
    %7 = arith.subf %1, %6 : vector<8x128xf32>
    %8 = arith.mulf %7, %7 : vector<8x128xf32>
    %cst_2 = arith.constant dense<0.000000e+00> : vector<8xf32>
    %9 = vector.multi_reduction <add>, %8, %cst_2 [1] : vector<8x128xf32> to vector<8xf32>
    %10 = vector.shape_cast %9 : vector<8xf32> to vector<8x1xf32>
    %cst_3 = arith.constant 1.280000e+02 : f32
    %11 = vector.broadcast %cst_3 : f32 to vector<8x1xf32>
    %12 = arith.divf %10, %11 : vector<8x1xf32>
    %cst_4 = arith.constant 9.99999974E-6 : f32
    %13 = vector.broadcast %cst_4 : f32 to vector<8x1xf32>
    %14 = arith.addf %12, %13 : vector<8x1xf32>
    %15 = math.rsqrt %14 : vector<8x1xf32>
    %16 = vector.broadcast %15 : vector<8x1xf32> to vector<8x128xf32>
    %17 = arith.mulf %7, %16 : vector<8x128xf32>
    %c0_5 = arith.constant 0 : index
    %c0_6 = arith.constant 0 : index
    %18 = vector.load %arg3[%c0_5, %c0_6] : memref<1x128xf32, #tpu.memory_space<vmem>>, vector<1x128xf32>
    %19 = vector.broadcast %18 : vector<1x128xf32> to vector<8x128xf32>
    %20 = arith.mulf %17, %19 : vector<8x128xf32>
    %c0_7 = arith.constant 0 : index
    %c0_8 = arith.constant 0 : index
    %21 = vector.load %arg4[%c0_7, %c0_8] : memref<1x128xf32, #tpu.memory_space<vmem>>, vector<1x128xf32>
    %22 = vector.broadcast %21 : vector<1x128xf32> to vector<8x128xf32>
    %23 = arith.addf %20, %22 : vector<8x128xf32>
    %24 = arith.truncf %23 : vector<8x128xf32> to vector<8x128xbf16>
    %c0_9 = arith.constant 0 : index
    %c0_10 = arith.constant 0 : index
    %25 = vector.load %arg5[%c0_9, %c0_10] : memref<128x384xbf16, #tpu.memory_space<vmem>>, vector<128x384xbf16>
    %cst_11 = arith.constant dense<0.000000e+00> : vector<8x384xf32>
    %26 = tpu.matmul %24, %25, %cst_11 {dimension_numbers = #tpu.dot_dimension_numbers<[1], [0], [0], [1], [0, 0, 1, 1], [], []>} : vector<8x128xbf16>, vector<128x384xbf16>, vector<8x384xf32> -> vector<8x384xf32>
    %c0_12 = arith.constant 0 : index
    %c0_13 = arith.constant 0 : index
    %27 = vector.load %arg6[%c0_12, %c0_13] : memref<1x384xf32, #tpu.memory_space<vmem>>, vector<1x384xf32>
    %28 = vector.broadcast %27 : vector<1x384xf32> to vector<8x384xf32>
    %29 = arith.addf %26, %28 : vector<8x384xf32>
    %30 = arith.truncf %29 : vector<8x384xf32> to vector<8x384xbf16>
    %c0_14 = arith.constant 0 : index
    %c0_15 = arith.constant 0 : index
    %31 = vector.load %arg7[%c0_14, %c0_15] : memref<8x384xbf16, #tpu.memory_space<vmem>>, vector<8x384xbf16>
    tpu.vector_store %arg7[%c0_14, %c0_15], %30 {strides = array<i32>} : memref<8x384xbf16, #tpu.memory_space<vmem>>, vector<8x384xbf16>,
    return
  }
  func.func @transform_0(%arg0: i32, %arg1: i32) -> (i32, i32) {
    %c0_i32 = arith.constant 0 : i32
    %c0_i32_0 = arith.constant 0 : i32
    return %arg0, %c0_i32 : i32, i32
  }
  func.func @transform_1(%arg0: i32, %arg1: i32) -> (i32, i32) {
    %c0_i32 = arith.constant 0 : i32
    %c0_i32_0 = arith.constant 0 : i32
    %c0_i32_1 = arith.constant 0 : i32
    return %c0_i32, %c0_i32_0 : i32, i32
  }
  func.func @transform_2(%arg0: i32, %arg1: i32) -> (i32, i32) {
    %c0_i32 = arith.constant 0 : i32
    %c0_i32_0 = arith.constant 0 : i32
    %c0_i32_1 = arith.constant 0 : i32
    return %c0_i32, %c0_i32_0 : i32, i32
  }
  func.func @transform_3(%arg0: i32, %arg1: i32) -> (i32, i32) {
    %c0_i32 = arith.constant 0 : i32
    %c0_i32_0 = arith.constant 0 : i32
    return %c0_i32, %arg1 : i32, i32
  }
  func.func @transform_4(%arg0: i32, %arg1: i32) -> (i32, i32) {
    %c0_i32 = arith.constant 0 : i32
    %c0_i32_0 = arith.constant 0 : i32
    return %c0_i32, %arg1 : i32, i32
  }
  func.func @transform_5(%arg0: i32, %arg1: i32) -> (i32, i32) {
    %c0_i32 = arith.constant 0 : i32
    return %arg0, %arg1 : i32, i32
  }
}

module attributes {stable_mosaic.version = 11 : i64} {
  func.func @_ln_linear_kernel(%arg0: i32, %arg1: i32, %arg2: memref<8x128xbf16, #tpu.memory_space<vmem>>, %arg3: memref<1x128xf32, #tpu.memory_space<vmem>>, %arg4: memref<1x128xf32, #tpu.memory_space<vmem>>, %arg5: memref<128x256xbf16, #tpu.memory_space<vmem>>, %arg6: memref<8x256xf32, #tpu.memory_space<vmem>>) attributes {dimension_semantics = [#tpu.dimension_semantics<parallel>, #tpu.dimension_semantics<parallel>], iteration_bounds = array<i64: 2, 1>, scalar_prefetch = 0 : i64, scratch_operands = 0 : i64, tpu.core_type = #tpu.core_type<tc>, window_params = [{transform_indices = @transform_0, window_bounds = array<i64: 8, 128>}, {pipeline_mode = #tpu.pipeline_mode<synchronous>, transform_indices = @transform_1, window_bounds = array<i64: 1, 128>}, {pipeline_mode = #tpu.pipeline_mode<synchronous>, transform_indices = @transform_2, window_bounds = array<i64: 1, 128>}, {transform_indices = @transform_3, window_bounds = array<i64: 128, 256>}, {transform_indices = @transform_4, window_bounds = array<i64: 8, 256>}]} {
    %c0 = arith.constant 0 : index
    %c0_0 = arith.constant 0 : index
    %0 = vector.load %arg2[%c0, %c0_0] : memref<8x128xbf16, #tpu.memory_space<vmem>>, vector<8x128xbf16>
    %1 = arith.extf %0 : vector<8x128xbf16> to vector<8x128xf32>
    %cst = arith.constant dense<0.000000e+00> : vector<8xf32>
    %2 = vector.multi_reduction <add>, %1, %cst [1] : vector<8x128xf32> to vector<8xf32>
    %3 = vector.shape_cast %2 : vector<8xf32> to vector<8x1xf32>
    %cst_1 = arith.constant 1.280000e+02 : f32
    %4 = vector.broadcast %cst_1 : f32 to vector<8x1xf32>
    %5 = arith.divf %3, %4 : vector<8x1xf32>
    %6 = vector.broadcast %5 : vector<8x1xf32> to vector<8x128xf32>
    %7 = arith.subf %1, %6 : vector<8x128xf32>
    %8 = arith.mulf %7, %7 : vector<8x128xf32>
    %cst_2 = arith.constant dense<0.000000e+00> : vector<8xf32>
    %9 = vector.multi_reduction <add>, %8, %cst_2 [1] : vector<8x128xf32> to vector<8xf32>
    %10 = vector.shape_cast %9 : vector<8xf32> to vector<8x1xf32>
    %cst_3 = arith.constant 1.280000e+02 : f32
    %11 = vector.broadcast %cst_3 : f32 to vector<8x1xf32>
    %12 = arith.divf %10, %11 : vector<8x1xf32>
    %cst_4 = arith.constant 9.99999974E-6 : f32
    %13 = vector.broadcast %cst_4 : f32 to vector<8x1xf32>
    %14 = arith.addf %12, %13 : vector<8x1xf32>
    %15 = math.rsqrt %14 : vector<8x1xf32>
    %16 = vector.broadcast %15 : vector<8x1xf32> to vector<8x128xf32>
    %17 = arith.mulf %7, %16 : vector<8x128xf32>
    %c0_5 = arith.constant 0 : index
    %c0_6 = arith.constant 0 : index
    %18 = vector.load %arg3[%c0_5, %c0_6] : memref<1x128xf32, #tpu.memory_space<vmem>>, vector<1x128xf32>
    %19 = vector.broadcast %18 : vector<1x128xf32> to vector<8x128xf32>
    %20 = arith.mulf %17, %19 : vector<8x128xf32>
    %c0_7 = arith.constant 0 : index
    %c0_8 = arith.constant 0 : index
    %21 = vector.load %arg4[%c0_7, %c0_8] : memref<1x128xf32, #tpu.memory_space<vmem>>, vector<1x128xf32>
    %22 = vector.broadcast %21 : vector<1x128xf32> to vector<8x128xf32>
    %23 = arith.addf %20, %22 : vector<8x128xf32>
    %24 = arith.truncf %23 : vector<8x128xf32> to vector<8x128xbf16>
    %c0_9 = arith.constant 0 : index
    %c0_10 = arith.constant 0 : index
    %25 = vector.load %arg5[%c0_9, %c0_10] : memref<128x256xbf16, #tpu.memory_space<vmem>>, vector<128x256xbf16>
    %cst_11 = arith.constant dense<0.000000e+00> : vector<8x256xf32>
    %26 = tpu.matmul %24, %25, %cst_11 {dimension_numbers = #tpu.dot_dimension_numbers<[1], [0], [0], [1], [0, 0, 1, 1], [], []>} : vector<8x128xbf16>, vector<128x256xbf16>, vector<8x256xf32> -> vector<8x256xf32>
    %c0_12 = arith.constant 0 : index
    %c0_13 = arith.constant 0 : index
    %27 = vector.load %arg6[%c0_12, %c0_13] : memref<8x256xf32, #tpu.memory_space<vmem>>, vector<8x256xf32>
    tpu.vector_store %arg6[%c0_12, %c0_13], %26 {strides = array<i32>} : memref<8x256xf32, #tpu.memory_space<vmem>>, vector<8x256xf32>,
    return
  }
  func.func @transform_0(%arg0: i32, %arg1: i32) -> (i32, i32) {
    %c0_i32 = arith.constant 0 : i32
    %c0_i32_0 = arith.constant 0 : i32
    return %arg0, %c0_i32 : i32, i32
  }
  func.func @transform_1(%arg0: i32, %arg1: i32) -> (i32, i32) {
    %c0_i32 = arith.constant 0 : i32
    %c0_i32_0 = arith.constant 0 : i32
    %c0_i32_1 = arith.constant 0 : i32
    return %c0_i32, %c0_i32_0 : i32, i32
  }
  func.func @transform_2(%arg0: i32, %arg1: i32) -> (i32, i32) {
    %c0_i32 = arith.constant 0 : i32
    %c0_i32_0 = arith.constant 0 : i32
    %c0_i32_1 = arith.constant 0 : i32
    return %c0_i32, %c0_i32_0 : i32, i32
  }
  func.func @transform_3(%arg0: i32, %arg1: i32) -> (i32, i32) {
    %c0_i32 = arith.constant 0 : i32
    %c0_i32_0 = arith.constant 0 : i32
    return %c0_i32, %arg1 : i32, i32
  }
  func.func @transform_4(%arg0: i32, %arg1: i32) -> (i32, i32) {
    %c0_i32 = arith.constant 0 : i32
    return %arg0, %arg1 : i32, i32
  }
}

</mosaic_0001>

<bundles_post_ra>
// kernel: decap_forward.10
= control target key start
LH: loop header
LB: loop body
LE: loop exit
PB: predicated region body
PF: predicated region fallthrough
CT: control target
= control target key end

     0   :  { %v134_v0 = vmov 0.0   ;;  %vm135_vm0 = vmmov 0   ;;  %vm55_vm1 = vcmask 523264   ;;  %s177_s1 = inlined_call_operand.vmem [shape: bf16[64,128], index: 1, kind: input, shape index: {}]   ;;  %s178_s0 = inlined_call_operand.vmem [shape: bf16[2,64], index: 0, kind: input, shape index: {}]   ;;  %s179_s2 = inlined_call_operand.vmem [shape: f32[1,128], index: 2, kind: input, shape index: {}]   ;;  %s180_s3 = inlined_call_operand.vmem [shape: bf16[2,128], index: 3, kind: output, shape index: {}]  }
   0x1   :  { %116 = vmatprep.subr.bf16.mxu0 %v134_v0  ;;  %v130_v1 = vld [vmem:[%s177_s1] sm:$0xff]   ;;  %124 = vmatprep.mubr.msk.bf16.mxu0 %vm135_vm0, %v134_v0  ;;  %v131_v2 = vld [vmem:[%s177_s1 + $0x8] sm:$0xff]   ;;  %v132_v3 = vld [vmem:[%s177_s1 + $0x10] sm:$0xff]  }
   0x2   :  { %117 = vmatpush3.bf16.msra.mxu0 %v130_v1  ;;  %v133_v4 = vld [vmem:[%s177_s1 + $0x18] sm:$0xff]   ;;  %v15_v5 = vld [vmem:[%s178_s0] sm:$0x1] }
   0x3   :  { %118 = vmatprep.subr.bf16.mxu0 %v134_v0  ;;  %v105_v6 = vld [vmem:[%s179_s2] ss:$0 sm:$0xff] }
   0x6   :  { %119 = vmatpush3.bf16.msra.mxu0 %v131_v2 }
   0x7   :  { %120 = vmatprep.subr.bf16.mxu0 %v134_v0 }
   0xa   :  { %121 = vmatpush3.bf16.msra.mxu0 %v132_v3 }
   0xb   :  { %122 = vmatprep.subr.bf16.mxu0 %v134_v0 }
   0xe   :  { %123 = vmatpush3.bf16.msra.mxu0 %v133_v4 }
  0x11   :  { %125 = vmatmul.mubr.msk.bf16.vlgmr.msra.gmra.mrb[0].mxu0 %vm55_vm1, %v15_v5 }
  0xe4   :  { %v93_v7 = vpop.f32.mrb[0].mxu0 }
  0xe5   :  { %v94_v8 = vadd.f32 %v105_v6, %v93_v7  ;;  %v126_v9 = vpop.f32.mrb[1].mxu0 }
  0xe6   :  { %v96_v10 = vpop.f32.mrb[2].mxu0 }
  0xe7   :  { %v99_v11 = vpack.c.bf16 %v94_v8, %v94_v8  ;;  %v127_v12 = vpop.f32.mrb[3].mxu0 }
  0xe9   :  { %100 = vst [vmem:[%s180_s3] sm:$0x1] %v99_v11 }

// kernel: decap_forward.13
= control target key start
LH: loop header
LB: loop body
LE: loop exit
PB: predicated region body
PF: predicated region fallthrough
CT: control target
= control target key end

     0   :  { %s639_s15 = smov 0   ;;  %s641_s16 = smov 0   ;;  %s706_s0 = inlined_call_operand.vmem [shape: bf16[16,128], index: 0, kind: input, shape index: {}]   ;;  %s707_s1 = inlined_call_operand.vmem [shape: bf16[128,128], index: 1, kind: input, shape index: {}]   ;;  %s708_s2 = inlined_call_operand.vmem [shape: f32[1,128], index: 2, kind: input, shape index: {}]   ;;  %s709_s3 = inlined_call_operand.vmem [shape: bf16[16,128], index: 3, kind: input, shape index: {}]   ;;  %s710_s4 = inlined_call_operand.vmem [shape: bf16[16,128], index: 4, kind: output, shape index: {}]  }
   0x1   :  { %s643_s17 = smov 0  }
   0x2 LB: > { %s26_s18 = sadd.s32 1, %s606_s16  ;;  %p510_p0 = scmp.ge.s32.totalorder %s610_s17, 1  ;;  %s610_s17 = sphi %s643_s17, %s14_s17   ;;  %s606_s16 = sphi %s641_s16, %s712_s16   ;;  %s602_s15 = sphi %s639_s15, %s711_s15  }
   0x3   : > { %p28_p1 = scmp.ge.s32.totalorder %s26_s18, 2  ;;  %p206_p2 = scmp.lt.s32.totalorder %s610_s17, 3 }
   0x5   : > { %s714_s18 = smov (%p28_p1, %s26_s18), 0  ;;  %p207_p3 = pnand %p510_p0, %p206_p2 }
   0x6   : > { %v580_v0 = vld [vmem:[%s707_s1] sm:$0xff] (!%p207_p3)   ;;  %v612_v1 = vmov (!%p207_p3), 0.0   ;;  %v581_v2 = vld [vmem:[%s707_s1 + $0x8] sm:$0xff] (!%p207_p3)   ;;  %vm613_vm0 = vmmov (!%p207_p3), 0   ;;  %v582_v3 = vld [vmem:[%s707_s1 + $0x10] sm:$0xff] (!%p207_p3)   ;;  %p247_p4 = scmp.lt.s32.totalorder (!%p207_p3), %s602_s15, 1 }
   0x7   : > { %210 = sbr.rel (%p207_p3) target bundleno = 258 (0x102), region = 36  ;;  %534 = vmatprep.subr.bf16.mxu0 (!%p207_p3), %v612_v1  ;;  %550 = vmatprep.mubr.msk.bf16.mxu0 (!%p207_p3), %vm613_vm0, %v612_v1  ;;  %v583_v4 = vld [vmem:[%s707_s1 + $0x18] sm:$0xff] (!%p207_p3)   ;;  %v584_v5 = vld [vmem:[%s707_s1 + $0x20] sm:$0xff] (!%p207_p3)   ;;  %v585_v6 = vld [vmem:[%s707_s1 + $0x28] sm:$0xff] (!%p207_p3)  }
   0x8   : > { %535 = vmatpush3.bf16.msra.mxu0 (!%p207_p3), %v580_v0  ;;  %v586_v7 = vld [vmem:[%s707_s1 + $0x30] sm:$0xff] (!%p207_p3)   ;;  %v587_v8 = vld [vmem:[%s707_s1 + $0x38] sm:$0xff] (!%p207_p3)   ;;  %v514_v11 = vld [vmem:[%s708_s2] ss:$0 sm:$0xff] (!%p207_p3) }
   0x9   : > { %536 = vmatprep.subr.bf16.mxu0 (!%p207_p3), %v612_v1 }
   0xc   : > { %537 = vmatpush3.bf16.msra.mxu0 (!%p207_p3), %v581_v2 }
   0xd   : > { %538 = vmatprep.subr.bf16.mxu0 (!%p207_p3), %v612_v1 }
   0xe   : > { %s716_s15 = smov (!%p247_p4, %s602_s15), 1 }
   0xf   : > { %s511_s7 = sshll.u32 %s716_s15, 2 }
  0x10   : > { %539 = vmatpush3.bf16.msra.mxu0 %v582_v3  ;;  %s250_s12 = scalar_lea.vmem %s706_s0, %s511_s7  ;;  %s264_s19 = scalar_lea.vmem %s709_s3, %s511_s7 }
  0x11   : > { %540 = vmatprep.subr.bf16.mxu0 %v612_v1  ;;  %v273_v9 = vld [vmem:[%s250_s12] sm:$0xf]  ;;  %s271_s23 = scalar_lea.vmem %s710_s4, %s511_s7 }
  0x12   : > { %v385_v10 = vld [vmem:[%s264_s19] sm:$0xf] }
  0x13   : > { %v386_v12 = vunpack.c.l.bf16 %v385_v10 }
  0x14   : > { %541 = vmatpush3.bf16.msra.mxu0 %v583_v4 }
  0x15   : > { %542 = vmatprep.subr.bf16.mxu0 %v612_v1 }
  0x18   : > { %543 = vmatpush3.bf16.msra.mxu0 %v584_v5 }
  0x19   : > { %544 = vmatprep.subr.bf16.mxu0 %v612_v1 }
  0x1c   : > { %545 = vmatpush3.bf16.msra.mxu0 %v585_v6 }
  0x1d   : > { %546 = vmatprep.subr.bf16.mxu0 %v612_v1 }
  0x20   : > { %547 = vmatpush3.bf16.msra.mxu0 %v586_v7 }
  0x21   : > { %548 = vmatprep.subr.bf16.mxu0 %v612_v1 }
  0x24   : > { %549 = vmatpush3.bf16.msra.mxu0 %v587_v8 }
  0x27   : > { %551 = vmatmul.mubr.bf16.vlgmr.msra.gmra.mrb[0].mxu0 %v273_v9 }
  0xfa   : > { %v379_v13 = vpop.f32.mrb[0].mxu0 }
  0xfb   : > { %v380_v14 = vadd.f32 %v514_v11, %v379_v13  ;;  %v552_v15 = vpop.f32.mrb[1].mxu0 }
  0xfc   : > { %v382_v16 = vpop.f32.mrb[2].mxu0 }
  0xfd   : > { %v387_v17 = vadd.f32 %v386_v12, %v380_v14  ;;  %v553_v18 = vpop.f32.mrb[3].mxu0 }
  0xff   : > { %v388_v19 = vpack.c.bf16 %v387_v17, %v387_v17 }
 0x101   : > { %389 = vst [vmem:[%s271_s23] sm:$0xf] %v388_v19 }
 0x102 PF: > { %s14_s17 = sadd.s32 1, %s610_s17   ;;  %s711_s15 = smov %s606_s16 }
 0x103   : > { %p11_p5 = scmp.ge.s32.totalorder %s14_s17, 4   ;;  %s712_s16 = smov %s714_s18 }
 0x105   :  { %13 = sbr.rel (!%p11_p5) target bundleno = 2 (0x2), region = 75 }

// kernel: decap_forward.12
= control target key start
LH: loop header
LB: loop body
LE: loop exit
PB: predicated region body
PF: predicated region fallthrough
CT: control target
= control target key end

     0   :  { %s788_s6 = smov 0   ;;  %s900_s0 = inlined_call_operand.vmem [shape: bf16[2,8,384], index: 0, kind: input, shape index: {}]   ;;  %s901_s1 = inlined_call_operand.vmem [shape: bf16[2,8,128], index: 1, kind: output, shape index: {}]  }
   0x1 LB: > { %s648_s7 = sadd.s32 4294967295, %s771_s6   ;;  %p652_p0 = scmp.ge.s32.totalorder %s771_s6, 1  ;;  %s771_s6 = sphi %s788_s6, %s11_s6  }
   0x2   : > { %p87_p1 = scmp.lt.s32.totalorder %s771_s6, 3 }
   0x4   : > { %p88_p2 = pnand %p652_p0, %p87_p1 }
   0x5   : > { %p106_p3 = scmp.lt.s32.totalorder (!%p88_p2), %s648_s7, 1  ;;  %v773_v0 = vmov (!%p88_p2), 0.0   ;;  %vm774_vm0 = vmmov (!%p88_p2), 0   ;;  %vm126_vm1 = vcmask (!%p88_p2), 261120   ;;  %v118_v4 = vlaneseq (!%p88_p2)  ;;  %s775_s12 = smov (!%p88_p2), 96  }
   0x6   : > { %91 = sbr.rel (%p88_p2) target bundleno = 1482 (0x5ca), region = 24  ;;  %684 = vmatprep.subr.bf16.mxu0 (!%p88_p2), %v773_v0  ;;  %686 = vmatprep.mubr.msk.bf16.mxu0 (!%p88_p2), %vm774_vm0, %v773_v0  ;;  %vm175_vm3 = vcmask (!%p88_p2), 64512   ;;  %s776_s13 = smov (!%p88_p2), 64   ;;  %vm191_vm4 = vcmask (!%p88_p2), 1043456   ;;  %vm589_vm5 = vcmask (!%p88_p2), 523264   ;;  %vm591_vm6 = vcmask (!%p88_p2), 785408  }
   0x7   : > { %690 = vmatprep.subr.bf16.mxu1 (!%p88_p2), %v773_v0  ;;  %692 = vmatprep.mubr.msk.bf16.mxu1 (!%p88_p2), %vm774_vm0, %v773_v0  ;;  %v816_v5 = vshrl.u32 (!%p88_p2), %v118_v4, 7  ;;  %v818_v6 = vand.u32 (!%p88_p2), 127, %v118_v4  ;;  %s777_s14 = smov (!%p88_p2), 32  }
   0x9   : > { %vm122_vm2 = vcmp.le.s32.totalorder (!%p88_p2), %v818_v6, %v816_v5 }
   0xd   : > { %s903_s7 = smov (!%p106_p3, %s648_s7), 1 }
   0xe   : > { %s732_s8 = smul.u32 12, %s903_s7  ;;  %s654_s15 = sshll.u32 %s903_s7, 2 }
   0xf   : > { %s114_s18 = scalar_lea.vmem %s901_s1, %s654_s15 }
  0x10   : > { %s808_s11 = scalar_lea.vmem %s900_s0, %s732_s8 }
  0x11   : > { %v116_v1 = vld [vmem:[%s808_s11] sm:$0xff]  ;;  %v833_v20 = vld [vmem:[%s808_s11 + $0x8] sm:$0xf] }
  0x12   : > { %v655_v2 = vcombine.high %v116_v1, %v116_v1  ;;  %v658_v14 = vcombine.low %v116_v1, %v116_v1  ;;  %v193_v21 = vsel %vm191_vm4, %v833_v20, 0  ;;  %v660_v6 = vcombine.low %v833_v20, %v833_v20 }
  0x13   : > { %691 = vmatpush3.bf16.msra.mxu1 %v193_v21 }
  0x14   : > { %v131_v3 = vsel %vm126_vm1, %v655_v2, 0  ;;  %239 = vrot.lane.b32.xlu1 %v655_v2, %s775_s12  ;;  %696 = vmatprep.subr.bf16.mxu1 %v773_v0 }
  0x15   : > { %685 = vmatpush3.bf16.xpose.msra.mxu0 %v131_v3 }
  0x16   : > { %702 = vmatprep.subr.bf16.mxu0 %v773_v0 }
  0x18   : > { %237 = vrot.lane.b32.xlu1 %v658_v14, %s775_s12 }
  0x1c   : > { %687 = vmatmul.mubr.msk.bf16.vlgmr.msra.gmra.mrb[0].mxu0 %vm126_vm1, %v116_v1  ;;  %352 = vrot.lane.b32.xlu1 %v658_v14, %s776_s13 }
  0x1d   : > { %704 = vmatprep.mubr.msk.bf16.mxu0 %vm774_vm0, %v773_v0 }
  0x20   : > { %466 = vrot.lane.b32.xlu1 %v655_v2, %s777_s14 }
  0x24   : > { %464 = vrot.lane.b32.xlu1 %v658_v14, %s777_s14 }
  0x86   : > { %v240_v24 = vpop.permute.xlu1 %239 }
  0x87   : > { %v245_v26 = vsel %vm126_vm1, %v240_v24, 0 }
  0x8a   : > { %v238_v28 = vpop.permute.xlu1 %237 }
  0x8e   : > { %v353_v30 = vpop.permute.xlu1 %352 }
  0x92   : > { %v467_v32 = vpop.permute.xlu1 %466 }
  0x93   : > { %v472_v33 = vsel %vm126_vm1, %v467_v32, 0 }
  0x96   : > { %v465_v34 = vpop.permute.xlu1 %464 }
  0xef   : > { %v167_v7 = vpop.f32.mrb[0].mxu0 }
  0xf0   : > { %v173_v8 = vmul.f32 0.17677669, %v167_v7  ;;  %v688_v9 = vpop.f32.mrb[1].mxu0 }
  0xf1   : > { %v170_v10 = vpop.f32.mrb[2].mxu0 }
  0xf2   : > { %v689_v11 = vpop.f32.mrb[3].mxu0  ;;  %v174_v12 = vsel %vm122_vm2, %v173_v8, -1e+30 }
  0xf3   : > { %v176_v13 = vsel %vm175_vm3, %v174_v12, -inf }
  0xf4   : > { %177 = vmax.xlane.f32.xlu0 %v176_v13 }
 0x181   : > { %v178_v15 = vpop.xlane.xlu0 %177 }
 0x182   : > { %v179_v16 = vsub.f32 %v174_v12, %v178_v15 }
 0x184   : > { %v180_v17 = vmul.f32 1.442695, %v179_v16 }
 0x186   : > { %749 = vpow2.f32 %v180_v17 }
 0x190   : > { %v750_v18 = vpop.eup %749 }
 0x191   : > { %v182_v19 = vsel %vm175_vm3, %v750_v18, 0.0 }
 0x192   : > { %183 = vadd.xlane.f32.xlu0 %v182_v19 }
 0x1a8   : > { %354 = vrot.lane.b32.xlu0 %v655_v2, %s776_s13 }
 0x21f   : > { %v184_v22 = vpop.xlane.xlu0 %183 }
 0x220   : > { %751 = vrcp.f32 %v184_v22 }
 0x223   : > { %v355_v29 = vpop.permute.xlu0 %354 }
 0x224   : > { %v360_v31 = vsel %vm126_vm1, %v355_v29, 0 }
 0x22a   : > { %v752_v23 = vpop.eup %751 }
 0x22b   : > { %v186_v25 = vmul.f32 %v752_v23, %v750_v18 }
 0x22d   : > { %v187_v27 = vpack.c.bf16 %v186_v25, %v186_v25 }
 0x22f   : > { %693 = vmatmul.mubr.msk.bf16.vlgmr.msra.gmra.mrb[0].mxu1 %vm175_vm3, %v187_v27 }
 0x230   : > { %697 = vmatpush3.bf16.xpose.msra.mxu1 %v245_v26  ;;  %698 = vmatprep.mubr.msk.bf16.mxu1 %vm774_vm0, %v773_v0 }
 0x231   : > { %708 = vmatprep.subr.bf16.mxu1 %v773_v0 }
 0x237   : > { %699 = vmatmul.mubr.msk.bf16.vlgmr.msra.gmra.mrb[4].mxu1 %vm126_vm1, %v238_v28 }
 0x238   : > { %709 = vmatpush3.bf16.xpose.msra.mxu1 %v360_v31  ;;  %710 = vmatprep.mubr.msk.bf16.mxu1 %vm774_vm0, %v773_v0 }
 0x239   : > { %720 = vmatprep.subr.bf16.mxu1 %v773_v0 }
 0x23f   : > { %711 = vmatmul.mubr.msk.bf16.vlgmr.msra.gmra.mrb[8].mxu1 %vm126_vm1, %v353_v30 }
 0x240   : > { %721 = vmatpush3.bf16.xpose.msra.mxu1 %v472_v33  ;;  %722 = vmatprep.mubr.msk.bf16.mxu1 %vm774_vm0, %v773_v0 }
 0x247   : > { %723 = vmatmul.mubr.msk.bf16.vlgmr.msra.gmra.mrb[12].mxu1 %vm126_vm1, %v465_v34 }
 0x302   : > { %v854_v35 = vpop.f32.mrb[0].mxu1 }
 0x303   : > { %v694_v36 = vpop.f32.mrb[1].mxu1 }
 0x304   : > { %v232_v37 = vpop.f32.mrb[2].mxu1 }
 0x305   : > { %v695_v38 = vpop.f32.mrb[3].mxu1 }
 0x30a   : > { %v281_v39 = vpop.f32.mrb[4].mxu1 }
 0x30b   : > { %v287_v40 = vmul.f32 0.17677669, %v281_v39  ;;  %v700_v41 = vpop.f32.mrb[5].mxu1 }
 0x30c   : > { %v284_v42 = vpop.f32.mrb[6].mxu1 }
 0x30d   : > { %v701_v43 = vpop.f32.mrb[7].mxu1  ;;  %v288_v44 = vsel %vm122_vm2, %v287_v40, -1e+30 }
 0x30e   : > { %v289_v45 = vsel %vm175_vm3, %v288_v44, -inf }
 0x30f   : > { %290 = vmax.xlane.f32.xlu1 %v289_v45 }
 0x312   : > { %v396_v46 = vpop.f32.mrb[8].mxu1 }
 0x313   : > { %v402_v47 = vmul.f32 0.17677669, %v396_v46  ;;  %v712_v48 = vpop.f32.mrb[9].mxu1 }
 0x314   : > { %v399_v49 = vpop.f32.mrb[10].mxu1 }
 0x315   : > { %v403_v50 = vsel %vm122_vm2, %v402_v47, -1e+30  ;;  %v713_v51 = vpop.f32.mrb[11].mxu1 }
 0x316   : > { %v404_v52 = vsel %vm175_vm3, %v403_v50, -inf }
 0x317   : > { %405 = vmax.xlane.f32.xlu0 %v404_v52 }
 0x31a   : > { %v508_v53 = vpop.f32.mrb[12].mxu1 }
 0x31b   : > { %v514_v54 = vmul.f32 0.17677669, %v508_v53  ;;  %v724_v55 = vpop.f32.mrb[13].mxu1 }
 0x31c   : > { %v511_v56 = vpop.f32.mrb[14].mxu1 }
 0x31d   : > { %v515_v57 = vsel %vm122_vm2, %v514_v54, -1e+30  ;;  %v725_v58 = vpop.f32.mrb[15].mxu1 }
 0x31e   : > { %v516_v59 = vsel %vm175_vm3, %v515_v57, -inf }
 0x31f   : > { %517 = vmax.xlane.f32.xlu1 %v516_v59 }
 0x39c   : > { %v291_v60 = vpop.xlane.xlu1 %290 }
 0x39d   : > { %v292_v61 = vsub.f32 %v288_v44, %v291_v60 }
 0x39f   : > { %v293_v62 = vmul.f32 1.442695, %v292_v61 }
 0x3a1   : > { %753 = vpow2.f32 %v293_v62 }
 0x3a4   : > { %v406_v63 = vpop.xlane.xlu0 %405 }
 0x3a5   : > { %v407_v1 = vsub.f32 %v403_v50, %v406_v63 }
 0x3a7   : > { %v408_v2 = vmul.f32 1.442695, %v407_v1 }
 0x3a9   : > { %755 = vpow2.f32 %v408_v2 }
 0x3ab   : > { %v754_v3 = vpop.eup %753 }
 0x3ac   : > { %v295_v4 = vsel %vm175_vm3, %v754_v3, 0.0  ;;  %v518_v8 = vpop.xlane.xlu1 %517 }
 0x3ad   : > { %296 = vadd.xlane.f32.xlu1 %v295_v4  ;;  %v519_v9 = vsub.f32 %v515_v57, %v518_v8 }
 0x3af   : > { %v520_v10 = vmul.f32 1.442695, %v519_v9 }
 0x3b1   : > { %757 = vpow2.f32 %v520_v10 }
 0x3b3   : > { %v756_v7 = vpop.eup %755 }
 0x3b4   : > { %v410_v5 = vsel %vm175_vm3, %v756_v7, 0.0 }
 0x3b5   : > { %411 = vadd.xlane.f32.xlu0 %v410_v5 }
 0x3bb   : > { %v758_v11 = vpop.eup %757 }
 0x3bc   : > { %v522_v12 = vsel %vm175_vm3, %v758_v11, 0.0 }
 0x3be   : > { %416 = vrot.lane.b32.xlu1 %v660_v6, %s776_s13 }
 0x3cb   : > { %304 = vrot.lane.b32.xlu0 %v660_v6, %s775_s12 }
 0x3e2   : > { %523 = vadd.xlane.f32.xlu1 %v522_v12 }
 0x3f3   : > { %528 = vrot.lane.b32.xlu1 %v660_v6, %s777_s14 }
 0x43a   : > { %v297_v13 = vpop.xlane.xlu1 %296 }
 0x43b   : > { %759 = vrcp.f32 %v297_v13 }
 0x43e   : > { %v417_v19 = vpop.permute.xlu1 %416 }
 0x43f   : > { %v422_v21 = vsel %vm191_vm4, %v417_v19, 0 }
 0x442   : > { %v412_v14 = vpop.xlane.xlu0 %411 }
 0x443   : > { %761 = vrcp.f32 %v412_v14 }
 0x445   : > { %v760_v15 = vpop.eup %759 }
 0x446   : > { %v299_v16 = vmul.f32 %v760_v15, %v754_v3  ;;  %v305_v17 = vpop.permute.xlu0 %304 }
 0x447   : > { %v310_v18 = vsel %vm191_vm4, %v305_v17, 0 }
 0x448   : > { %703 = vmatpush3.bf16.msra.mxu0 %v310_v18  ;;  %v300_v20 = vpack.c.bf16 %v299_v16, %v299_v16 }
 0x449   : > { %714 = vmatprep.subr.bf16.mxu0 %v773_v0 }
 0x44b   : > { %705 = vmatmul.mubr.msk.bf16.vlgmr.msra.gmra.mrb[4].mxu0 %vm175_vm3, %v300_v20 }
 0x44c   : > { %715 = vmatpush3.bf16.msra.mxu0 %v422_v21  ;;  %716 = vmatprep.mubr.msk.bf16.mxu0 %vm774_vm0, %v773_v0 }
 0x44d   : > { %v762_v22 = vpop.eup %761  ;;  %726 = vmatprep.subr.bf16.mxu0 %v773_v0 }
 0x44e   : > { %v414_v23 = vmul.f32 %v762_v22, %v756_v7 }
 0x450   : > { %v415_v24 = vpack.c.bf16 %v414_v23, %v414_v23 }
 0x453   : > { %717 = vmatmul.mubr.msk.bf16.vlgmr.msra.gmra.mrb[8].mxu0 %vm175_vm3, %v415_v24 }
 0x454   : > { %728 = vmatprep.mubr.msk.bf16.mxu0 %vm774_vm0, %v773_v0 }
 0x46f   : > { %v524_v25 = vpop.xlane.xlu1 %523 }
 0x470   : > { %763 = vrcp.f32 %v524_v25 }
 0x473   : > { %v529_v26 = vpop.permute.xlu1 %528 }
 0x474   : > { %v534_v27 = vsel %vm191_vm4, %v529_v26, 0 }
 0x475   : > { %727 = vmatpush3.bf16.msra.mxu0 %v534_v27 }
 0x47a   : > { %v764_v28 = vpop.eup %763 }
 0x47b   : > { %v526_v29 = vmul.f32 %v764_v28, %v758_v11 }
 0x47d   : > { %v527_v30 = vpack.c.bf16 %v526_v29, %v526_v29 }
 0x47f   : > { %729 = vmatmul.mubr.msk.bf16.vlgmr.msra.gmra.mrb[12].mxu0 %vm175_vm3, %v527_v30 }
 0x51e   : > { %v346_v31 = vpop.f32.mrb[4].mxu0 }
 0x51f   : > { %577 = vrot.lane.b32.xlu0 %v346_v31, %s777_s14  ;;  %v706_v32 = vpop.f32.mrb[5].mxu0 }
 0x520   : > { %v349_v33 = vpop.f32.mrb[6].mxu0 }
 0x521   : > { %v707_v34 = vpop.f32.mrb[7].mxu0 }
 0x526   : > { %v458_v36 = vpop.f32.mrb[8].mxu0 }
 0x527   : > { %581 = vrot.lane.b32.xlu1 %v458_v36, %s776_s13  ;;  %v718_v0 = vpop.f32.mrb[9].mxu0 }
 0x528   : > { %v461_v37 = vpop.f32.mrb[10].mxu0 }
 0x529   : > { %v719_v38 = vpop.f32.mrb[11].mxu0 }
 0x552   : > { %v570_v39 = vpop.f32.mrb[12].mxu0 }
 0x553   : > { %585 = vrot.lane.b32.xlu0 %v570_v39, %s775_s12  ;;  %v730_v40 = vpop.f32.mrb[13].mxu0 }
 0x554   : > { %v573_v41 = vpop.f32.mrb[14].mxu0 }
 0x555   : > { %v731_v42 = vpop.f32.mrb[15].mxu0 }
 0x591   : > { %v578_v43 = vpop.permute.xlu0 %577 }
 0x592   : > { %v588_v45 = vsel %vm126_vm1, %v854_v35, %v578_v43 }
 0x599   : > { %v582_v44 = vpop.permute.xlu1 %581 }
 0x59a   : > { %v590_v46 = vsel %vm589_vm5, %v588_v45, %v582_v44 }
 0x5c5   : > { %v586_v47 = vpop.permute.xlu0 %585 }
 0x5c6   : > { %v592_v48 = vsel %vm591_vm6, %v590_v46, %v586_v47 }
 0x5c7   : > { %v593_v49 = vpack.c.bf16 %v592_v48, %v592_v48 }
 0x5c9   : > { %594 = vst [vmem:[%s114_s18] sm:$0xf] %v593_v49 }
 0x5ca PF: > { %s11_s6 = sadd.s32 1, %s771_s6  }
 0x5cb   : > { %p8_p4 = scmp.ge.s32.totalorder %s11_s6, 4  }
 0x5cd   :  { %10 = sbr.rel (!%p8_p4) target bundleno = 1 (0x1), region = 54 }

// kernel: decap_forward.11
= control target key start
LH: loop header
LB: loop body
LE: loop exit
PB: predicated region body
PF: predicated region fallthrough
CT: control target
= control target key end

     0   :  { %10 = vsyncpa [#allocation3], 0  ;;  %s938_s18 = smov 0   ;;  %s940_s19 = smov 0   ;;  %s1027_s0 = inlined_call_operand.vmem [shape: bf16[16,128], index: 0, kind: input, shape index: {}]   ;;  %s1028_s1 = inlined_call_operand.vmem [shape: f32[1,128], index: 1, kind: input, shape index: {}]   ;;  %s1029_s2 = inlined_call_operand.vmem [shape: f32[1,128], index: 2, kind: input, shape index: {}]   ;;  %s1030_s3 = inlined_call_operand.hbm [shape: bf16[128,384], index: 3, kind: input, shape index: {}]   ;;  %s1031_s4 = inlined_call_operand.vmem [shape: f32[1,384], index: 4, kind: input, shape index: {}]   ;;  %s1032_s5 = inlined_call_operand.vmem [shape: bf16[16,384], index: 5, kind: output, shape index: {}]  }
   0x1   :  { %s942_s20 = smov 0  }
   0x2 LB: > { %s700_s21 = sadd.s32 4294967295, %s900_s20   ;;  %s28_s22 = sadd.s32 1, %s896_s19  ;;  %s900_s20 = sphi %s942_s20, %s16_s20   ;;  %s896_s19 = sphi %s940_s19, %s1042_s19   ;;  %s892_s18 = sphi %s938_s18, %s1041_s18  }
   0x3   : > { %p30_p0 = scmp.ge.s32.totalorder %s28_s22, 2  ;;  %p702_p1 = scmp.ge.s32.totalorder %s900_s20, 1 }
   0x4   : > { %p181_p2 = scmp.lt.s32.totalorder %s900_s20, 3  ;;  %p963_p4 = scmp.eq.s32.totalorder %s700_s21, 0 }
   0x5   : > { %s1044_s22 = smov (%p30_p0, %s28_s22), 0  ;;  %s902_s25 = smov [#allocation2]  }
   0x6   : > { %p959_p3 = pnand %p702_p1, %p181_p2  ;;  %s202_s26 = sshll.u32 %s902_s25, 4  ;;  %s203_s26 = int_to_ptr.vmem [resolvable:$true] %s202_s26 }
   0x7   : > { %s1037_s24 = scalar_select %p963_p4, 1, 0 }
   0x8   : > { %s1036_s23 = scalar_select %p959_p3, 1, 0 }
   0x9   : > { %p776_p5 = pneg %p959_p3  ;;  %s846_s30 = scalar_lea.hbm %s1030_s3, 3072 }
   0xa   : > { %p847_p7 = scmp.ne.s32.totalorder %s1030_s3, %s846_s30  ;;  %p853_p11 = scmp.lt.u32.totalorder %s846_s30, %s1030_s3 }
   0xb   : > { %p971_p6 = pnand %p963_p4, %p776_p5 }
   0xd   : > { %p848_p8 = pneg %p971_p6 }
   0xf   : > { %p849_p9 = pnand %p848_p8, %p847_p7 }
  0x11   : > { %p850_p10 = pneg %p849_p9 }
  0x13   : > { %p855_p12 = pnand %p853_p11, %p850_p10 }
  0x15   : > { %858 = shalt.err (!%p855_p12)
}
  0x16   : > { %s859_s10 = scalar_lea.vmem %s203_s26, 3072  ;;  %p867_p2 = scmp.lt.s32.totalorder %s203_s26, %s203_s26 }
  0x17   : > { %p860_p13 = scmp.ne.s32.totalorder %s203_s26, %s859_s10  ;;  %p868_p5 = scmp.lt.s32.totalorder %s859_s10, %s859_s10 }
  0x19   : > { %p862_p0 = pnand %p860_p13, %p848_p8  ;;  %p869_p4 = por %p868_p5, %p867_p2 }
  0x1b   : > { %p863_p1 = pneg %p862_p0 }
  0x1d   : > { %p870_p3 = pnand %p869_p4, %p863_p1 }
  0x1f   : > { %873 = shalt.err (!%p870_p3)
}
  0x20   : > { %s903_s11 = smov 192   ;;  %s904_s12 = smov 12  }
  0x21   : > { %779 = dma.hbm_to_vmem [thread:$0]  (!%p971_p6), %s1030_s3, 3072, %s203_s26, [#allocation3], %s903_s11, %s903_s11, %s904_s12  }
  0x22   : > { %p1039_p7 = scmp.ne.s32.totalorder %s1036_s23, 0 }
  0x23   : > { %p1040_p9 = scmp.ne.s32.totalorder (!%p1039_p7), %s1037_s24, 0 }
  0x24   : > { %233 = sbr.rel (%p1039_p7) target bundleno = 583 (0x247), region = 40 }
  0x2b   : > { %887 = dma.done.wait (%p1040_p9), [#allocation3], 3072  }
  0x2c   : > { %889 = vsyncadd (%p1040_p9), [#allocation3], 4294964224  ;;  %p268_p3 = scmp.lt.s32.totalorder %s892_s18, 1  ;;  %v812_v2 = vld [vmem:[#allocation2 + $0x4] ss:$12 sps:$4 sm:$0xff]   ;;  %v905_v4 = vmov 0.0   ;;  %v354_v42 = vlaneseq }
  0x2d   : > { %v814_v3 = vld [vmem:[#allocation2] ss:$12 sps:$4 sm:$0xff]   ;;  %751 = vmatprep.subr.bf16.mxu1 %v905_v4  ;;  %v815_v5 = vld [vmem:[#allocation2 + $0x8] ss:$12 sps:$4 sm:$0xff]   ;;  %497 = vmatprep.subr.bf16.mxu0 %v812_v2  ;;  %v818_v7 = vld [vmem:[#allocation2 + $0x18] ss:$12 sps:$4 sm:$0xff]  }
  0x2e   : > { %s1046_s18 = smov (!%p268_p3, %s892_s18), 1  ;;  %v816_v6 = vld [vmem:[#allocation2 + $0x1c] ss:$12 sps:$4 sm:$0xff]   ;;  %498 = vmatpush1.bf16.msra.mxu0 %v814_v3  ;;  %752 = vmatpush3.bf16.msra.mxu1 %v815_v5  ;;  %v819_v8 = vld [vmem:[#allocation2 + $0x20] ss:$12 sps:$4 sm:$0xff]   ;;  %v906_v26 = vmov 0  }
  0x2f   : > { %s708_s15 = sshll.u32 %s1046_s18, 2  ;;  %499 = vmatprep.subr.bf16.mxu0 %v816_v6  ;;  %753 = vmatprep.subr.bf16.mxu1 %v905_v4  ;;  %v820_v9 = vld [vmem:[#allocation2 + $0x34] ss:$12 sps:$4 sm:$0xff]   ;;  %v822_v14 = vld [vmem:[#allocation2 + $0x30] ss:$12 sps:$4 sm:$0xff]   ;;  %vm907_vm0 = vmmov 0  }
  0x30   : > { %s271_s21 = scalar_lea.vmem %s1027_s0, %s708_s15  ;;  %v823_v15 = vld [vmem:[#allocation2 + $0x38] ss:$12 sps:$4 sm:$0xff]   ;;  %v826_v17 = vld [vmem:[#allocation2 + $0x48] ss:$12 sps:$4 sm:$0xff]   ;;  %v827_v18 = vld [vmem:[#allocation2 + $0x50] ss:$12 sps:$4 sm:$0xff]   ;;  %529 = vmatprep.mubr.bf16.mxu0 %v906_v26  ;;  %767 = vmatprep.mubr.msk.bf16.mxu1 %vm907_vm0, %v905_v4 }
  0x31   : > { %v289_v0 = vld [vmem:[%s271_s21] sm:$0xf]  ;;  %v824_v16 = vld [vmem:[#allocation2 + $0x4c] ss:$12 sps:$4 sm:$0xff]   ;;  %v828_v19 = vld [vmem:[#allocation2 + $0x64] ss:$12 sps:$4 sm:$0xff]  }
  0x32   : > { %v290_v1 = vunpack.c.l.bf16 %v289_v0  ;;  %500 = vmatpush1.bf16.msra.mxu0 %v818_v7  ;;  %754 = vmatpush3.bf16.msra.mxu1 %v819_v8  ;;  %v830_v20 = vld [vmem:[#allocation2 + $0x60] ss:$12 sps:$4 sm:$0xff]   ;;  %v831_v21 = vld [vmem:[#allocation2 + $0x68] ss:$12 sps:$4 sm:$0xff]   ;;  %v834_v23 = vld [vmem:[#allocation2 + $0x78] ss:$12 sps:$4 sm:$0xff]  }
  0x33   : > { %501 = vmatprep.subr.bf16.mxu0 %v820_v9  ;;  %755 = vmatprep.subr.bf16.mxu1 %v905_v4  ;;  %v832_v22 = vld [vmem:[#allocation2 + $0x7c] ss:$12 sps:$4 sm:$0xff]   ;;  %v835_v24 = vld [vmem:[#allocation2 + $0x80] ss:$12 sps:$4 sm:$0xff]   ;;  %v839_v28 = vld [vmem:[#allocation2 + $0x98] ss:$12 sps:$4 sm:$0xff]  }
  0x34   : > { %291 = vadd.xlane.f32.xlu0 %v290_v1  ;;  %v836_v25 = vld [vmem:[#allocation2 + $0x94] ss:$12 sps:$4 sm:$0xff]   ;;  %v838_v27 = vld [vmem:[#allocation2 + $0x90] ss:$12 sps:$4 sm:$0xff]   ;;  %v840_v29 = vld [vmem:[#allocation2 + $0xac] ss:$12 sps:$4 sm:$0xff]  }
  0x35   : > { %v842_v30 = vld [vmem:[#allocation2 + $0xa8] ss:$12 sps:$4 sm:$0xff]   ;;  %v843_v31 = vld [vmem:[#allocation2 + $0xb0] ss:$12 sps:$4 sm:$0xff]   ;;  %v710_v36 = vld [vmem:[%s1028_s1] ss:$0 sm:$0xff] }
  0x36   : > { %502 = vmatpush1.bf16.msra.mxu0 %v822_v14  ;;  %756 = vmatpush3.bf16.msra.mxu1 %v823_v15  ;;  %v711_v38 = vld [vmem:[%s1029_s2] ss:$0 sm:$0xff]  ;;  %v355_v43 = vshrl.u32 %v354_v42, 7  ;;  %s771_s29 = smul.u32 12, %s1046_s18 }
  0x37   : > { %757 = vmatprep.subr.bf16.mxu1 %v905_v4  ;;  %503 = vmatprep.subr.bf16.mxu0 %v824_v16  ;;  %v352_v46 = vld [vmem:[%s1031_s4] sm:$0x7] }
  0x38   : > { %v356_v44 = vsub.s32 0, %v355_v43  ;;  %v364_v45 = vsub.s32 2, %v355_v43  ;;  %v360_v47 = vsub.s32 1, %v355_v43  ;;  %s286_s7 = scalar_lea.vmem %s1032_s5, %s771_s29 }
  0x3a   : > { %504 = vmatpush1.bf16.msra.mxu0 %v826_v17  ;;  %758 = vmatpush3.bf16.msra.mxu1 %v827_v18  ;;  %v357_v48 = vrot.slane %v352_v46, %v356_v44  ;;  %v365_v49 = vrot.slane %v352_v46, %v364_v45  ;;  %v361_v50 = vrot.slane %v352_v46, %v360_v47 }
  0x3b   : > { %759 = vmatprep.subr.bf16.mxu1 %v905_v4  ;;  %505 = vmatprep.subr.bf16.mxu0 %v828_v19 }
  0x3e   : > { %506 = vmatpush1.bf16.msra.mxu0 %v830_v20  ;;  %760 = vmatpush3.bf16.msra.mxu1 %v831_v21 }
  0x3f   : > { %507 = vmatprep.subr.bf16.mxu0 %v832_v22  ;;  %761 = vmatprep.subr.bf16.mxu1 %v905_v4 }
  0x42   : > { %508 = vmatpush1.bf16.msra.mxu0 %v834_v23  ;;  %762 = vmatpush3.bf16.msra.mxu1 %v835_v24 }
  0x43   : > { %509 = vmatprep.subr.bf16.mxu0 %v836_v25  ;;  %763 = vmatprep.subr.bf16.mxu1 %v905_v4 }
  0x46   : > { %510 = vmatpush1.bf16.msra.mxu0 %v838_v27  ;;  %764 = vmatpush3.bf16.msra.mxu1 %v839_v28 }
  0x47   : > { %511 = vmatprep.subr.bf16.mxu0 %v840_v29  ;;  %765 = vmatprep.subr.bf16.mxu1 %v905_v4 }
  0x4a   : > { %512 = vmatpush1.bf16.msra.mxu0 %v842_v30  ;;  %766 = vmatpush3.bf16.msra.mxu1 %v843_v31 }
  0xc1   : > { %v292_v10 = vpop.xlane.xlu0 %291 }
  0xc2   : > { %v294_v11 = vmul.f32 0.0078125, %v292_v10 }
  0xc4   : > { %v295_v12 = vsub.f32 %v290_v1, %v294_v11 }
  0xc6   : > { %v296_v13 = vmul.f32 %v295_v12, %v295_v12 }
  0xc8   : > { %297 = vadd.xlane.f32.xlu0 %v296_v13 }
 0x155   : > { %v298_v32 = vpop.xlane.xlu0 %297 }
 0x156   : > { %v299_v33 = vmul.f32 0.0078125, %v298_v32 }
 0x158   : > { %v300_v34 = vadd.f32 1e-05, %v299_v33 }
 0x15a   : > { %844 = vrsqrt.f32 %v300_v34 }
 0x164   : > { %v845_v35 = vpop.eup %844 }
 0x165   : > { %v302_v37 = vmul.f32 %v845_v35, %v295_v12 }
 0x167   : > { %v310_v39 = vmul.f32 %v710_v36, %v302_v37 }
 0x169   : > { %v318_v40 = vadd.f32 %v711_v38, %v310_v39 }
 0x16b   : > { %v319_v41 = vpack.c.bf16 %v318_v40, %v318_v40 }
 0x16d   : > { %530 = vmatmul.mubr.bf16.vlgmr.msra.gmra.mrb[0].mxu0 %v319_v41  ;;  %768 = vmatmul.mubr.bf16.vlgmr.msra.gmra.mrb[0].mxu1 %v319_v41 }
 0x240   : > { %v531_v51 = vpop.f32.mrb[0].mxu0  ;;  %v572_v52 = vpop.f32.mrb[0].mxu1 }
 0x241   : > { %v532_v53 = vadd.f32 %v531_v51, %v357_v48  ;;  %v573_v54 = vadd.f32 %v572_v52, %v365_v49  ;;  %v533_v55 = vpop.f32.mrb[1].mxu0  ;;  %v769_v56 = vpop.f32.mrb[1].mxu1 }
 0x242   : > { %v534_v57 = vadd.f32 %v533_v55, %v361_v50  ;;  %v535_v58 = vpop.f32.mrb[2].mxu0  ;;  %v575_v59 = vpop.f32.mrb[2].mxu1 }
 0x243   : > { %v741_v60 = vpack.c.bf16 %v573_v54, %v573_v54  ;;  %v536_v61 = vpop.f32.mrb[3].mxu0  ;;  %v770_v62 = vpop.f32.mrb[3].mxu1 }
 0x244   : > { %v740_v63 = vpack.c.bf16 %v534_v57, %v532_v53 }
 0x245   : > { %592 = vst [vmem:[%s286_s7 + $0x8] sm:$0xf] %v741_v60 }
 0x246   : > { %591 = vst [vmem:[%s286_s7] sm:$0xff] %v740_v63 }
 0x247 PF: > { %s16_s20 = sadd.s32 1, %s900_s20   ;;  %s1041_s18 = smov %s896_s19 }
 0x248   : > { %p13_p4 = scmp.ge.s32.totalorder %s16_s20, 4   ;;  %s1042_s19 = smov %s1044_s22 }
 0x24a   :  { %15 = sbr.rel (!%p13_p4) target bundleno = 2 (0x2), region = 79 }
 0x251   :  { %623 = vsyncpa [#allocation3], 1 }
 0x252   :  { %625 = vsyncpa [#allocation3 + $0x1], 1 }

// kernel: decap_forward.15
= control target key start
LH: loop header
LB: loop body
LE: loop exit
PB: predicated region body
PF: predicated region fallthrough
CT: control target
= control target key end

     0   :  { %s888_s18 = smov 0   ;;  %s890_s19 = smov 0   ;;  %s1006_s0 = inlined_call_operand.vmem [shape: bf16[16,128], index: 0, kind: input, shape index: {}]   ;;  %s1007_s1 = inlined_call_operand.vmem [shape: f32[1,128], index: 1, kind: input, shape index: {}]   ;;  %s1008_s2 = inlined_call_operand.vmem [shape: f32[1,128], index: 2, kind: input, shape index: {}]   ;;  %s1009_s3 = inlined_call_operand.vmem [shape: bf16[128,384], index: 3, kind: input, shape index: {}]   ;;  %s1010_s4 = inlined_call_operand.vmem [shape: f32[1,384], index: 4, kind: input, shape index: {}]   ;;  %s1011_s5 = inlined_call_operand.vmem [shape: bf16[16,384], index: 5, kind: output, shape index: {}]  }
   0x1   :  { %s892_s20 = smov 0  }
   0x2 LB: > { %s27_s21 = sadd.s32 1, %s849_s19  ;;  %p705_p0 = scmp.ge.s32.totalorder %s853_s20, 1  ;;  %s853_s20 = sphi %s892_s20, %s15_s20   ;;  %s849_s19 = sphi %s890_s19, %s1013_s19   ;;  %s845_s18 = sphi %s888_s18, %s1012_s18  }
   0x3   : > { %p29_p1 = scmp.ge.s32.totalorder %s27_s21, 2  ;;  %p221_p2 = scmp.lt.s32.totalorder %s853_s20, 3 }
   0x5   : > { %s1015_s21 = smov (%p29_p1, %s27_s21), 0  ;;  %p222_p3 = pnand %p705_p0, %p221_p2 }
   0x6   : > { %p261_p4 = scmp.lt.s32.totalorder (!%p222_p3), %s845_s18, 1  ;;  %v797_v2 = vld [vmem:[%s1009_s3 + $0x4] ss:$12 sps:$4 sm:$0xff] (!%p222_p3)   ;;  %v799_v3 = vld [vmem:[%s1009_s3] ss:$12 sps:$4 sm:$0xff] (!%p222_p3)   ;;  %v855_v4 = vmov (!%p222_p3), 0.0   ;;  %v352_v42 = vlaneseq (!%p222_p3) }
   0x7   : > { %225 = sbr.rel (%p222_p3) target bundleno = 551 (0x227), region = 40  ;;  %749 = vmatprep.subr.bf16.mxu1 (!%p222_p3), %v855_v4  ;;  %v800_v5 = vld [vmem:[%s1009_s3 + $0x8] ss:$12 sps:$4 sm:$0xff] (!%p222_p3)   ;;  %495 = vmatprep.subr.bf16.mxu0 (!%p222_p3), %v797_v2  ;;  %v803_v7 = vld [vmem:[%s1009_s3 + $0x18] ss:$12 sps:$4 sm:$0xff] (!%p222_p3)   ;;  %v856_v26 = vmov (!%p222_p3), 0  }
   0x8   : > { %v801_v6 = vld [vmem:[%s1009_s3 + $0x1c] ss:$12 sps:$4 sm:$0xff] (!%p222_p3)   ;;  %496 = vmatpush1.bf16.msra.mxu0 (!%p222_p3), %v799_v3  ;;  %750 = vmatpush3.bf16.msra.mxu1 (!%p222_p3), %v800_v5  ;;  %v804_v8 = vld [vmem:[%s1009_s3 + $0x20] ss:$12 sps:$4 sm:$0xff] (!%p222_p3)   ;;  %v808_v15 = vld [vmem:[%s1009_s3 + $0x38] ss:$12 sps:$4 sm:$0xff] (!%p222_p3)  }
   0x9   : > { %497 = vmatprep.subr.bf16.mxu0 (!%p222_p3), %v801_v6  ;;  %751 = vmatprep.subr.bf16.mxu1 (!%p222_p3), %v855_v4  ;;  %v805_v9 = vld [vmem:[%s1009_s3 + $0x34] ss:$12 sps:$4 sm:$0xff] (!%p222_p3)   ;;  %v807_v14 = vld [vmem:[%s1009_s3 + $0x30] ss:$12 sps:$4 sm:$0xff] (!%p222_p3)   ;;  %v809_v16 = vld [vmem:[%s1009_s3 + $0x4c] ss:$12 sps:$4 sm:$0xff] (!%p222_p3)  }
   0xa   : > { %v811_v17 = vld [vmem:[%s1009_s3 + $0x48] ss:$12 sps:$4 sm:$0xff] (!%p222_p3)   ;;  %v812_v18 = vld [vmem:[%s1009_s3 + $0x50] ss:$12 sps:$4 sm:$0xff] (!%p222_p3)   ;;  %v815_v20 = vld [vmem:[%s1009_s3 + $0x60] ss:$12 sps:$4 sm:$0xff] (!%p222_p3)   ;;  %527 = vmatprep.mubr.bf16.mxu0 (!%p222_p3), %v856_v26 }
   0xb   : > { %v813_v19 = vld [vmem:[%s1009_s3 + $0x64] ss:$12 sps:$4 sm:$0xff] (!%p222_p3)   ;;  %v816_v21 = vld [vmem:[%s1009_s3 + $0x68] ss:$12 sps:$4 sm:$0xff] (!%p222_p3)   ;;  %v820_v24 = vld [vmem:[%s1009_s3 + $0x80] ss:$12 sps:$4 sm:$0xff] (!%p222_p3)  }
   0xc   : > { %498 = vmatpush1.bf16.msra.mxu0 (!%p222_p3), %v803_v7  ;;  %752 = vmatpush3.bf16.msra.mxu1 (!%p222_p3), %v804_v8  ;;  %v817_v22 = vld [vmem:[%s1009_s3 + $0x7c] ss:$12 sps:$4 sm:$0xff] (!%p222_p3)   ;;  %v819_v23 = vld [vmem:[%s1009_s3 + $0x78] ss:$12 sps:$4 sm:$0xff] (!%p222_p3)   ;;  %v821_v25 = vld [vmem:[%s1009_s3 + $0x94] ss:$12 sps:$4 sm:$0xff] (!%p222_p3)  }
   0xd   : > { %499 = vmatprep.subr.bf16.mxu0 (!%p222_p3), %v805_v9  ;;  %753 = vmatprep.subr.bf16.mxu1 (!%p222_p3), %v855_v4  ;;  %vm857_vm0 = vmmov (!%p222_p3), 0   ;;  %v823_v27 = vld [vmem:[%s1009_s3 + $0x90] ss:$12 sps:$4 sm:$0xff] (!%p222_p3)   ;;  %v824_v28 = vld [vmem:[%s1009_s3 + $0x98] ss:$12 sps:$4 sm:$0xff] (!%p222_p3)   ;;  %v353_v43 = vshrl.u32 (!%p222_p3), %v352_v42, 7 }
   0xe   : > { %s1017_s18 = smov (!%p261_p4, %s845_s18), 1  ;;  %765 = vmatprep.mubr.msk.bf16.mxu1 %vm857_vm0, %v855_v4  ;;  %v825_v29 = vld [vmem:[%s1009_s3 + $0xac] ss:$12 sps:$4 sm:$0xff]   ;;  %v827_v30 = vld [vmem:[%s1009_s3 + $0xa8] ss:$12 sps:$4 sm:$0xff]  }
   0xf   : > { %s706_s22 = sshll.u32 %s1017_s18, 2  ;;  %v828_v31 = vld [vmem:[%s1009_s3 + $0xb0] ss:$12 sps:$4 sm:$0xff]   ;;  %v708_v36 = vld [vmem:[%s1007_s1] ss:$0 sm:$0xff]  ;;  %v354_v44 = vsub.s32 0, %v353_v43 }
  0x10   : > { %s264_s25 = scalar_lea.vmem %s1006_s0, %s706_s22  ;;  %500 = vmatpush1.bf16.msra.mxu0 %v807_v14  ;;  %754 = vmatpush3.bf16.msra.mxu1 %v808_v15  ;;  %v709_v38 = vld [vmem:[%s1008_s2] ss:$0 sm:$0xff]  ;;  %v362_v45 = vsub.s32 2, %v353_v43  ;;  %v358_v47 = vsub.s32 1, %v353_v43  ;;  %s769_s13 = smul.u32 12, %s1017_s18 }
  0x11   : > { %v287_v0 = vld [vmem:[%s264_s25] sm:$0xf]  ;;  %755 = vmatprep.subr.bf16.mxu1 %v855_v4  ;;  %501 = vmatprep.subr.bf16.mxu0 %v809_v16 }
  0x12   : > { %v288_v1 = vunpack.c.l.bf16 %v287_v0  ;;  %v350_v46 = vld [vmem:[%s1010_s4] sm:$0x7]  ;;  %s284_s16 = scalar_lea.vmem %s1011_s5, %s769_s13 }
  0x13   : > { %v355_v48 = vrot.slane %v350_v46, %v354_v44  ;;  %v363_v49 = vrot.slane %v350_v46, %v362_v45  ;;  %v359_v50 = vrot.slane %v350_v46, %v358_v47 }
  0x14   : > { %289 = vadd.xlane.f32.xlu0 %v288_v1  ;;  %502 = vmatpush1.bf16.msra.mxu0 %v811_v17 }
  0x15   : > { %756 = vmatpush3.bf16.msra.mxu1 %v812_v18  ;;  %503 = vmatprep.subr.bf16.mxu0 %v813_v19 }
  0x16   : > { %757 = vmatprep.subr.bf16.mxu1 %v855_v4 }
  0x18   : > { %504 = vmatpush1.bf16.msra.mxu0 %v815_v20 }
  0x19   : > { %758 = vmatpush3.bf16.msra.mxu1 %v816_v21  ;;  %505 = vmatprep.subr.bf16.mxu0 %v817_v22 }
  0x1a   : > { %759 = vmatprep.subr.bf16.mxu1 %v855_v4 }
  0x1c   : > { %506 = vmatpush1.bf16.msra.mxu0 %v819_v23 }
  0x1d   : > { %760 = vmatpush3.bf16.msra.mxu1 %v820_v24  ;;  %507 = vmatprep.subr.bf16.mxu0 %v821_v25 }
  0x1e   : > { %761 = vmatprep.subr.bf16.mxu1 %v855_v4 }
  0x20   : > { %508 = vmatpush1.bf16.msra.mxu0 %v823_v27 }
  0x21   : > { %762 = vmatpush3.bf16.msra.mxu1 %v824_v28  ;;  %509 = vmatprep.subr.bf16.mxu0 %v825_v29 }
  0x22   : > { %763 = vmatprep.subr.bf16.mxu1 %v855_v4 }
  0x24   : > { %510 = vmatpush1.bf16.msra.mxu0 %v827_v30 }
  0x25   : > { %764 = vmatpush3.bf16.msra.mxu1 %v828_v31 }
  0xa1   : > { %v290_v10 = vpop.xlane.xlu0 %289 }
  0xa2   : > { %v292_v11 = vmul.f32 0.0078125, %v290_v10 }
  0xa4   : > { %v293_v12 = vsub.f32 %v288_v1, %v292_v11 }
  0xa6   : > { %v294_v13 = vmul.f32 %v293_v12, %v293_v12 }
  0xa8   : > { %295 = vadd.xlane.f32.xlu0 %v294_v13 }
 0x135   : > { %v296_v32 = vpop.xlane.xlu0 %295 }
 0x136   : > { %v297_v33 = vmul.f32 0.0078125, %v296_v32 }
 0x138   : > { %v298_v34 = vadd.f32 1e-05, %v297_v33 }
 0x13a   : > { %829 = vrsqrt.f32 %v298_v34 }
 0x144   : > { %v830_v35 = vpop.eup %829 }
 0x145   : > { %v300_v37 = vmul.f32 %v830_v35, %v293_v12 }
 0x147   : > { %v308_v39 = vmul.f32 %v708_v36, %v300_v37 }
 0x149   : > { %v316_v40 = vadd.f32 %v709_v38, %v308_v39 }
 0x14b   : > { %v317_v41 = vpack.c.bf16 %v316_v40, %v316_v40 }
 0x14d   : > { %528 = vmatmul.mubr.bf16.vlgmr.msra.gmra.mrb[0].mxu0 %v317_v41  ;;  %766 = vmatmul.mubr.bf16.vlgmr.msra.gmra.mrb[0].mxu1 %v317_v41 }
 0x220   : > { %v529_v51 = vpop.f32.mrb[0].mxu0  ;;  %v570_v52 = vpop.f32.mrb[0].mxu1 }
 0x221   : > { %v530_v53 = vadd.f32 %v529_v51, %v355_v48  ;;  %v571_v54 = vadd.f32 %v570_v52, %v363_v49  ;;  %v531_v55 = vpop.f32.mrb[1].mxu0  ;;  %v767_v56 = vpop.f32.mrb[1].mxu1 }
 0x222   : > { %v532_v57 = vadd.f32 %v531_v55, %v359_v50  ;;  %v533_v58 = vpop.f32.mrb[2].mxu0  ;;  %v573_v59 = vpop.f32.mrb[2].mxu1 }
 0x223   : > { %v739_v60 = vpack.c.bf16 %v571_v54, %v571_v54  ;;  %v534_v61 = vpop.f32.mrb[3].mxu0  ;;  %v768_v62 = vpop.f32.mrb[3].mxu1 }
 0x224   : > { %v738_v63 = vpack.c.bf16 %v532_v57, %v530_v53 }
 0x225   : > { %590 = vst [vmem:[%s284_s16 + $0x8] sm:$0xf] %v739_v60 }
 0x226   : > { %589 = vst [vmem:[%s284_s16] sm:$0xff] %v738_v63 }
 0x227 PF: > { %s15_s20 = sadd.s32 1, %s853_s20   ;;  %s1012_s18 = smov %s849_s19 }
 0x228   : > { %p12_p5 = scmp.ge.s32.totalorder %s15_s20, 4   ;;  %s1013_s19 = smov %s1015_s21 }
 0x22a   :  { %14 = sbr.rel (!%p12_p5) target bundleno = 2 (0x2), region = 76 }

// kernel: decap_forward.19
= control target key start
LH: loop header
LB: loop body
LE: loop exit
PB: predicated region body
PF: predicated region fallthrough
CT: control target
= control target key end

     0   :  { %9 = vsyncpa [#allocation3], 0  ;;  %s890_s0 = inlined_call_operand.vmem [shape: bf16[16,128], index: 0, kind: input, shape index: {}]   ;;  %s891_s1 = inlined_call_operand.vmem [shape: f32[1,128], index: 1, kind: input, shape index: {}]   ;;  %s892_s2 = inlined_call_operand.vmem [shape: f32[1,128], index: 2, kind: input, shape index: {}]   ;;  %s893_s3 = inlined_call_operand.vmem [shape: bf16[128,256], index: 3, kind: input, shape index: {}]   ;;  %s894_s4 = inlined_call_operand.hbm [shape: f32[16,256], index: 4, kind: output, shape index: {}]  }
   0x1   :  { %11 = vsyncpa [#allocation3 + $0x1], 0  ;;  %s724_s15 = smov 0   ;;  %s726_s16 = smov 0  }
   0x2   :  { %s728_s17 = smov 0   ;;  %s730_s18 = smov 0  }
   0x3   :  { %s732_s19 = smov 0   ;;  %s734_s20 = smov 0  }
   0x4 LB: > { %s503_s21 = sadd.s32 4294967295, %s695_s20   ;;  %s504_s22 = sadd.s32 4294967294, %s695_s20   ;;  %s695_s20 = sphi %s734_s20, %s17_s20   ;;  %s691_s19 = sphi %s732_s19, %s901_s19   ;;  %s687_s18 = sphi %s730_s18, %s900_s18   ;;  %s683_s17 = sphi %s728_s17, %s899_s17   ;;  %s679_s16 = sphi %s726_s16, %s898_s16   ;;  %s675_s15 = sphi %s724_s15, %s897_s15  }
   0x5   : > { %s29_s23 = sadd.s32 1, %s691_s19  ;;  %s132_s24 = sadd.s32 1, %s683_s17 }
   0x6   : > { %p31_p0 = scmp.ge.s32.totalorder %s29_s23, 2  ;;  %p142_p1 = scmp.ne.s32.totalorder %s683_s17, %s679_s16 }
   0x7   : > { %p143_p2 = scmp.eq.s32.totalorder %s503_s21, 1  ;;  %p148_p3 = scmp.ne.s32.totalorder %s679_s16, %s675_s15 }
   0x8   : > { %s903_s23 = smov (%p31_p0, %s29_s23), 0  ;;  %p149_p5 = scmp.eq.s32.totalorder %s504_s22, 1 }
   0x9   : > { %p764_p4 = por %p143_p2, %p142_p1  ;;  %s127_s26 = ssub.s32 %s691_s19, %s903_s23 }
   0xa   : > { %p508_p6 = scmp.ge.s32.totalorder %s695_s20, 1  ;;  %p130_p7 = scmp.eq.s32.totalorder %s127_s26, 0 }
   0xb   : > { %p771_p8 = por %p149_p5, %p148_p3  ;;  %p189_p9 = scmp.lt.s32.totalorder %s695_s20, 3 }
   0xc   : > { %s777_s28 = scalar_select %p130_p7, %s683_s17, %s132_s24  }
   0xd   : > { %p190_p10 = pnand %p508_p6, %p189_p9 }
   0xe   : > { %p219_p11 = scmp.lt.s32.totalorder (!%p190_p10), %s687_s18, 1  ;;  %v591_v2 = vld [vmem:[%s893_s3 + $0x4] ss:$8 sps:$4 sm:$0xff] (!%p190_p10)   ;;  %v593_v3 = vld [vmem:[%s893_s3] ss:$8 sps:$4 sm:$0xff] (!%p190_p10)   ;;  %v697_v17 = vmov (!%p190_p10), 0  }
   0xf   : > { %193 = sbr.rel (%p190_p10) target bundleno = 570 (0x23a), region = 36  ;;  %v594_v4 = vld [vmem:[%s893_s3 + $0x14] ss:$8 sps:$4 sm:$0xff] (!%p190_p10)   ;;  %358 = vmatprep.subr.bf16.mxu0 (!%p190_p10), %v591_v2  ;;  %v596_v5 = vld [vmem:[%s893_s3 + $0x10] ss:$8 sps:$4 sm:$0xff] (!%p190_p10)   ;;  %390 = vmatprep.mubr.bf16.mxu0 (!%p190_p10), %v697_v17  ;;  %s216_s12 = sand.u32 (!%p190_p10), 1, %s679_s16  }
  0x10   : > { %359 = vmatpush1.bf16.msra.mxu0 (!%p190_p10), %v593_v3  ;;  %v597_v6 = vld [vmem:[%s893_s3 + $0x24] ss:$8 sps:$4 sm:$0xff] (!%p190_p10)   ;;  %v599_v11 = vld [vmem:[%s893_s3 + $0x20] ss:$8 sps:$4 sm:$0xff] (!%p190_p10)   ;;  %v600_v12 = vld [vmem:[%s893_s3 + $0x34] ss:$8 sps:$4 sm:$0xff] (!%p190_p10)  }
  0x11   : > { %360 = vmatprep.subr.bf16.mxu0 (!%p190_p10), %v594_v4  ;;  %v602_v13 = vld [vmem:[%s893_s3 + $0x30] ss:$8 sps:$4 sm:$0xff] (!%p190_p10)   ;;  %v603_v14 = vld [vmem:[%s893_s3 + $0x44] ss:$8 sps:$4 sm:$0xff] (!%p190_p10)   ;;  %v605_v15 = vld [vmem:[%s893_s3 + $0x40] ss:$8 sps:$4 sm:$0xff] (!%p190_p10)  }
  0x12   : > { %v606_v16 = vld [vmem:[%s893_s3 + $0x54] ss:$8 sps:$4 sm:$0xff] (!%p190_p10)   ;;  %v608_v18 = vld [vmem:[%s893_s3 + $0x50] ss:$8 sps:$4 sm:$0xff] (!%p190_p10)   ;;  %v609_v19 = vld [vmem:[%s893_s3 + $0x64] ss:$8 sps:$4 sm:$0xff] (!%p190_p10)  }
  0x13   : > { %v611_v20 = vld [vmem:[%s893_s3 + $0x60] ss:$8 sps:$4 sm:$0xff] (!%p190_p10)   ;;  %v612_v21 = vld [vmem:[%s893_s3 + $0x74] ss:$8 sps:$4 sm:$0xff] (!%p190_p10)   ;;  %v614_v22 = vld [vmem:[%s893_s3 + $0x70] ss:$8 sps:$4 sm:$0xff] (!%p190_p10)  }
  0x14   : > { %361 = vmatpush1.bf16.msra.mxu0 (!%p190_p10), %v596_v5  ;;  %v511_v27 = vld [vmem:[%s891_s1] ss:$0 sm:$0xff] (!%p190_p10)  ;;  %s509_s13 = sshll.u32 (!%p190_p10), %s216_s12, 4  ;;  %s534_s22 = sshll.u32 (!%p190_p10), %s687_s18, 8 }
  0x15   : > { %362 = vmatprep.subr.bf16.mxu0 (!%p190_p10), %v597_v6  ;;  %v512_v29 = vld [vmem:[%s892_s2] ss:$0 sm:$0xff] (!%p190_p10)  ;;  %s218_s14 = scalar_lea.vmem (!%p190_p10), [#allocation2], %s509_s13 }
  0x16   : > { %s220_s29 = scalar_select %p219_p11, %s687_s18, 1 }
  0x17   : > { %s418_s21 = sshll.u32 %s218_s14, 4  ;;  %s698_s18 = smov [#allocation2]   ;;  %s840_s21 = int_to_ptr.vmem [resolvable:$true] %s418_s21 }
  0x18   : > { %s510_s30 = sshll.u32 %s220_s29, 2  ;;  %363 = vmatpush1.bf16.msra.mxu0 %v599_v11  ;;  %s845_s29 = scalar_lea.hbm %s894_s4, %s534_s22 }
  0x19   : > { %s222_s7 = scalar_lea.vmem %s890_s0, %s510_s30  ;;  %364 = vmatprep.subr.bf16.mxu0 %v600_v12  ;;  %s402_s30 = scalar_lea.sflag [#allocation3], %s216_s12 }
  0x1a   : > { %v231_v0 = vld [vmem:[%s222_s7] sm:$0xf]  ;;  %s617_s5 = scalar_lea.vmem %s840_s21, 256  ;;  %s621_s6 = sshll.u32 %s698_s18, 4  ;;  %s622_s6 = int_to_ptr.vmem [resolvable:$false] %s621_s6 }
  0x1b   : > { %v232_v1 = vunpack.c.l.bf16 %v231_v0  ;;  %p618_p12 = scmp.ne.s32.totalorder %s840_s21, %s617_s5  ;;  %s623_s7 = scalar_lea.vmem %s622_s6, 512 }
  0x1c   : > { %365 = vmatpush1.bf16.msra.mxu0 %v602_v13  ;;  %p624_p1 = scmp.lt.s32.totalorder %s840_s21, %s622_s6  ;;  %p625_p2 = scmp.lt.s32.totalorder %s623_s7, %s617_s5 }
  0x1d   : > { %233 = vadd.xlane.f32.xlu0 %v232_v1  ;;  %366 = vmatprep.subr.bf16.mxu0 %v603_v14  ;;  %p619_p13 = pnand %p618_p12, %p764_p4 }
  0x1e   : > { %p626_p3 = por %p625_p2, %p624_p1 }
  0x1f   : > { %p620_p0 = pneg %p619_p13 }
  0x20   : > { %367 = vmatpush1.bf16.msra.mxu0 %v605_v15 }
  0x21   : > { %368 = vmatprep.subr.bf16.mxu0 %v606_v16  ;;  %p627_p5 = pnand %p626_p3, %p620_p0 }
  0x24   : > { %369 = vmatpush1.bf16.msra.mxu0 %v608_v18 }
  0x25   : > { %370 = vmatprep.subr.bf16.mxu0 %v609_v19 }
  0x28   : > { %371 = vmatpush1.bf16.msra.mxu0 %v611_v20 }
  0x29   : > { %372 = vmatprep.subr.bf16.mxu0 %v612_v21 }
  0x2c   : > { %373 = vmatpush1.bf16.msra.mxu0 %v614_v22 }
  0xaa   : > { %v234_v7 = vpop.xlane.xlu0 %233 }
  0xab   : > { %v236_v8 = vmul.f32 0.0078125, %v234_v7 }
  0xad   : > { %v237_v9 = vsub.f32 %v232_v1, %v236_v8 }
  0xaf   : > { %v238_v10 = vmul.f32 %v237_v9, %v237_v9 }
  0xb1   : > { %239 = vadd.xlane.f32.xlu0 %v238_v10 }
 0x13e   : > { %v240_v23 = vpop.xlane.xlu0 %239 }
 0x13f   : > { %v241_v24 = vmul.f32 0.0078125, %v240_v23 }
 0x141   : > { %v242_v25 = vadd.f32 1e-05, %v241_v24 }
 0x143   : > { %615 = vrsqrt.f32 %v242_v25 }
 0x14d   : > { %v616_v26 = vpop.eup %615 }
 0x14e   : > { %v244_v28 = vmul.f32 %v616_v26, %v237_v9 }
 0x150   : > { %v252_v30 = vmul.f32 %v511_v27, %v244_v28 }
 0x152   : > { %v260_v31 = vadd.f32 %v512_v29, %v252_v30 }
 0x154   : > { %v261_v32 = vpack.c.bf16 %v260_v31, %v260_v31 }
 0x156   : > { %391 = vmatmul.mubr.bf16.vlgmr.msra.gmra.mrb[0].mxu0 %v261_v32 }
 0x229   : > { %v392_v33 = vpop.f32.mrb[0].mxu0 }
 0x22a   : > { %399 = vst [vmem:[%s218_s14] sm:$0xff] %v392_v33  ;;  %v394_v34 = vpop.f32.mrb[1].mxu0 }
 0x22b   : > { %400 = vst [vmem:[%s218_s14 + $0x8] sm:$0xff] %v394_v34  ;;  %v396_v35 = vpop.f32.mrb[2].mxu0 }
 0x22c   : > { %v397_v36 = vpop.f32.mrb[3].mxu0 }
 0x22d   : > { %630 = shalt.err (!%p627_p5)
}
 0x22e   : > { %s631_s8 = scalar_lea.hbm %s845_s29, 256  ;;  %s635_s11 = scalar_lea.hbm %s894_s4, 512 }
 0x22f   : > { %p632_p6 = scmp.ne.s32.totalorder %s845_s29, %s631_s8  ;;  %p636_p10 = scmp.lt.u32.totalorder %s845_s29, %s894_s4 }
 0x230   : > { %p637_p11 = scmp.lt.u32.totalorder %s635_s11, %s631_s8  ;;  %p639_p13 = scmp.lt.u32.totalorder %s631_s8, %s845_s29 }
 0x231   : > { %p633_p7 = pnand %p632_p6, %p764_p4 }
 0x232   : > { %p638_p12 = por %p637_p11, %p636_p10 }
 0x233   : > { %p634_p9 = pneg %p633_p7 }
 0x234   : > { %p640_p0 = por %p639_p13, %p638_p12 }
 0x236   : > { %p641_p1 = pnand %p640_p0, %p634_p9 }
 0x238   : > { %644 = shalt.err (!%p641_p1)
}
 0x239   : > { %535 = dma.vmem_to_hbm [thread:$0]  (%p764_p4), %s840_s21, 256, %s845_s29, %s402_s30  }
 0x23a PF: > { %p541_p2 = scmp.ge.s32.totalorder %s695_s20, 2  ;;  %s430_s14 = sand.u32 1, %s675_s15  }
 0x23b   : > { %s431_s22 = scalar_lea.sflag [#allocation3], %s430_s14 }
 0x23c   : > { %p538_p3 = pnand %p541_p2, %p771_p8 }
 0x23e   : > { %670 = dma.done.wait (!%p538_p3), %s431_s22, 256  }
 0x23f   : > { %672 = vsyncadd (!%p538_p3), %s431_s22, 4294967040  ;;  %s17_s20 = sadd.s32 1, %s695_s20   ;;  %s897_s15 = smov %s679_s16 }
 0x240   : > { %p14_p5 = scmp.ge.s32.totalorder %s17_s20, 4   ;;  %s898_s16 = smov %s683_s17 }
 0x241   : > { %s899_s17 = smov %s777_s28  ;;  %s900_s18 = smov %s691_s19 }
 0x242   : > { %s901_s19 = smov %s903_s23  ;;  %16 = sbr.rel (!%p14_p5) target bundleno = 4 (0x4), region = 74 }
 0x249   :  { %436 = vsyncpa [#allocation3], 1 }
 0x24a   :  { %438 = vsyncpa [#allocation3 + $0x1], 1 }

// kernel: decap_forward.14
= control target key start
LH: loop header
LB: loop body
LE: loop exit
PB: predicated region body
PF: predicated region fallthrough
CT: control target
= control target key end

     0   :  { %s1487_s24 = smov 0   ;;  %s1489_s25 = smov 0   ;;  %s1740_s0 = inlined_call_operand.vmem [shape: bf16[16,128], index: 0, kind: input, shape index: {}]   ;;  %s1741_s1 = inlined_call_operand.vmem [shape: f32[1,128], index: 1, kind: input, shape index: {}]   ;;  %s1742_s2 = inlined_call_operand.vmem [shape: f32[1,128], index: 2, kind: input, shape index: {}]   ;;  %s1743_s3 = inlined_call_operand.vmem [shape: bf16[128,512], index: 3, kind: input, shape index: {}]   ;;  %s1744_s4 = inlined_call_operand.vmem [shape: f32[1,512], index: 4, kind: input, shape index: {}]   ;;  %s1745_s5 = inlined_call_operand.vmem [shape: bf16[512,128], index: 5, kind: input, shape index: {}]   ;;  %s1746_s6 = inlined_call_operand.vmem [shape: f32[1,128], index: 6, kind: input, shape index: {}]   ;;  %s1747_s7 = inlined_call_operand.vmem [shape: bf16[16,128], index: 7, kind: output, shape index: {}]  }
   0x1   :  { %s1491_s26 = smov 0  }
   0x2 LB: > { %s29_s27 = sadd.s32 1, %s1440_s25  ;;  %p1191_p0 = scmp.ge.s32.totalorder %s1444_s26, 1  ;;  %s1444_s26 = sphi %s1491_s26, %s17_s26   ;;  %s1440_s25 = sphi %s1489_s25, %s1749_s25   ;;  %s1436_s24 = sphi %s1487_s24, %s1748_s24  }
   0x3   : > { %p31_p1 = scmp.ge.s32.totalorder %s29_s27, 2  ;;  %p280_p2 = scmp.lt.s32.totalorder %s1444_s26, 3 }
   0x5   : > { %s1751_s27 = smov (%p31_p1, %s29_s27), 0  ;;  %p281_p3 = pnand %p1191_p0, %p280_p2 }
   0x6   : > { %p324_p4 = scmp.lt.s32.totalorder (!%p281_p3), %s1436_s24, 1  ;;  %v1332_v2 = vld [vmem:[%s1743_s3 + $0x4] ss:$16 sps:$4 sm:$0xff] (!%p281_p3)   ;;  %v1334_v3 = vld [vmem:[%s1743_s3 + $0xc] ss:$16 sps:$4 sm:$0xff] (!%p281_p3)   ;;  %v1446_v38 = vmov (!%p281_p3), 0  }
   0x7   : > { %284 = sbr.rel (%p281_p3) target bundleno = 810 (0x32a), region = 48  ;;  %602 = vmatprep.subr.bf16.mxu0 (!%p281_p3), %v1332_v2  ;;  %643 = vmatprep.subr.bf16.mxu1 (!%p281_p3), %v1334_v3  ;;  %v1336_v8 = vld [vmem:[%s1743_s3] ss:$16 sps:$4 sm:$0xff] (!%p281_p3)   ;;  %v1337_v9 = vld [vmem:[%s1743_s3 + $0x8] ss:$16 sps:$4 sm:$0xff] (!%p281_p3)  }
   0x8   : > { %603 = vmatpush1.bf16.msra.mxu0 (!%p281_p3), %v1336_v8  ;;  %644 = vmatpush1.bf16.msra.mxu1 (!%p281_p3), %v1337_v9  ;;  %v1338_v10 = vld [vmem:[%s1743_s3 + $0x24] ss:$16 sps:$4 sm:$0xff] (!%p281_p3)   ;;  %v1340_v11 = vld [vmem:[%s1743_s3 + $0x2c] ss:$16 sps:$4 sm:$0xff] (!%p281_p3)   ;;  %v1342_v12 = vld [vmem:[%s1743_s3 + $0x20] ss:$16 sps:$4 sm:$0xff] (!%p281_p3)  }
   0x9   : > { %v1343_v13 = vld [vmem:[%s1743_s3 + $0x28] ss:$16 sps:$4 sm:$0xff] (!%p281_p3)   ;;  %604 = vmatprep.subr.bf16.mxu0 (!%p281_p3), %v1338_v10  ;;  %645 = vmatprep.subr.bf16.mxu1 (!%p281_p3), %v1340_v11  ;;  %v1344_v14 = vld [vmem:[%s1743_s3 + $0x44] ss:$16 sps:$4 sm:$0xff] (!%p281_p3)   ;;  %v1346_v15 = vld [vmem:[%s1743_s3 + $0x4c] ss:$16 sps:$4 sm:$0xff] (!%p281_p3)  }
   0xa   : > { %v1348_v16 = vld [vmem:[%s1743_s3 + $0x40] ss:$16 sps:$4 sm:$0xff] (!%p281_p3)   ;;  %v1349_v17 = vld [vmem:[%s1743_s3 + $0x48] ss:$16 sps:$4 sm:$0xff] (!%p281_p3)   ;;  %v1350_v18 = vld [vmem:[%s1743_s3 + $0x64] ss:$16 sps:$4 sm:$0xff] (!%p281_p3)   ;;  %634 = vmatprep.mubr.bf16.mxu0 (!%p281_p3), %v1446_v38  ;;  %675 = vmatprep.mubr.bf16.mxu1 (!%p281_p3), %v1446_v38 }
   0xb   : > { %v1352_v19 = vld [vmem:[%s1743_s3 + $0x6c] ss:$16 sps:$4 sm:$0xff] (!%p281_p3)   ;;  %v1354_v20 = vld [vmem:[%s1743_s3 + $0x60] ss:$16 sps:$4 sm:$0xff] (!%p281_p3)   ;;  %v1355_v21 = vld [vmem:[%s1743_s3 + $0x68] ss:$16 sps:$4 sm:$0xff] (!%p281_p3)  }
   0xc   : > { %605 = vmatpush1.bf16.msra.mxu0 (!%p281_p3), %v1342_v12  ;;  %646 = vmatpush1.bf16.msra.mxu1 (!%p281_p3), %v1343_v13  ;;  %v1356_v22 = vld [vmem:[%s1743_s3 + $0x84] ss:$16 sps:$4 sm:$0xff] (!%p281_p3)   ;;  %v1358_v23 = vld [vmem:[%s1743_s3 + $0x8c] ss:$16 sps:$4 sm:$0xff] (!%p281_p3)   ;;  %v1360_v24 = vld [vmem:[%s1743_s3 + $0x80] ss:$16 sps:$4 sm:$0xff] (!%p281_p3)  }
   0xd   : > { %606 = vmatprep.subr.bf16.mxu0 (!%p281_p3), %v1344_v14  ;;  %647 = vmatprep.subr.bf16.mxu1 (!%p281_p3), %v1346_v15  ;;  %v1361_v25 = vld [vmem:[%s1743_s3 + $0x88] ss:$16 sps:$4 sm:$0xff] (!%p281_p3)   ;;  %v1362_v26 = vld [vmem:[%s1743_s3 + $0xa4] ss:$16 sps:$4 sm:$0xff] (!%p281_p3)   ;;  %v1364_v27 = vld [vmem:[%s1743_s3 + $0xac] ss:$16 sps:$4 sm:$0xff] (!%p281_p3)  }
   0xe   : > { %s1753_s24 = smov (!%p324_p4, %s1436_s24), 1  ;;  %v1366_v28 = vld [vmem:[%s1743_s3 + $0xa0] ss:$16 sps:$4 sm:$0xff]   ;;  %v1367_v29 = vld [vmem:[%s1743_s3 + $0xa8] ss:$16 sps:$4 sm:$0xff]  }
   0xf   : > { %s1192_s28 = sshll.u32 %s1753_s24, 2  ;;  %v1368_v30 = vld [vmem:[%s1743_s3 + $0xc4] ss:$16 sps:$4 sm:$0xff]   ;;  %v1370_v31 = vld [vmem:[%s1743_s3 + $0xcc] ss:$16 sps:$4 sm:$0xff]  }
  0x10   : > { %s1513_s8 = scalar_lea.vmem %s1740_s0, %s1192_s28  ;;  %607 = vmatpush1.bf16.msra.mxu0 %v1348_v16  ;;  %648 = vmatpush1.bf16.msra.mxu1 %v1349_v17  ;;  %v1372_v32 = vld [vmem:[%s1743_s3 + $0xc0] ss:$16 sps:$4 sm:$0xff]   ;;  %v1373_v33 = vld [vmem:[%s1743_s3 + $0xc8] ss:$16 sps:$4 sm:$0xff]   ;;  %v1374_v34 = vld [vmem:[%s1743_s3 + $0xe4] ss:$16 sps:$4 sm:$0xff]  }
  0x11   : > { %v354_v0 = vld [vmem:[%s1513_s8] sm:$0xf]  ;;  %608 = vmatprep.subr.bf16.mxu0 %v1350_v18  ;;  %649 = vmatprep.subr.bf16.mxu1 %v1352_v19  ;;  %v1376_v35 = vld [vmem:[%s1743_s3 + $0xec] ss:$16 sps:$4 sm:$0xff]   ;;  %v1379_v37 = vld [vmem:[%s1743_s3 + $0xe8] ss:$16 sps:$4 sm:$0xff]   ;;  %v422_v18 = vlaneseq }
  0x12   : > { %v355_v1 = vunpack.c.l.bf16 %v354_v0  ;;  %v1378_v36 = vld [vmem:[%s1743_s3 + $0xe0] ss:$16 sps:$4 sm:$0xff]   ;;  %v1384_v54 = vld [vmem:[%s1745_s5 + $0x48] sm:$0xff]   ;;  %v1392_v62 = vld [vmem:[%s1745_s5 + $0x58] sm:$0xff]  }
  0x13   : > { %v1194_v43 = vld [vmem:[%s1741_s1] ss:$0 sm:$0xff]  ;;  %v1385_v55 = vld [vmem:[%s1745_s5 + $0xc8] sm:$0xff]   ;;  %v1388_v58 = vld [vmem:[%s1745_s5 + $0x50] sm:$0xff]   ;;  %v423_v19 = vshrl.u32 %v422_v18, 7 }
  0x14   : > { %356 = vadd.xlane.f32.xlu0 %v355_v1  ;;  %609 = vmatpush1.bf16.msra.mxu0 %v1354_v20  ;;  %v1195_v45 = vld [vmem:[%s1742_s2] ss:$0 sm:$0xff]  ;;  %v1386_v56 = vld [vmem:[%s1745_s5 + $0x8] sm:$0xff]   ;;  %v1389_v59 = vld [vmem:[%s1745_s5 + $0xd0] sm:$0xff]  }
  0x15   : > { %650 = vmatpush1.bf16.msra.mxu1 %v1355_v21  ;;  %610 = vmatprep.subr.bf16.mxu0 %v1356_v22  ;;  %v1380_v50 = vld [vmem:[%s1745_s5 + $0x40] sm:$0xff]   ;;  %v1387_v57 = vld [vmem:[%s1745_s5 + $0x88] sm:$0xff]   ;;  %v1390_v60 = vld [vmem:[%s1745_s5 + $0x10] sm:$0xff]   ;;  %v424_v20 = vsub.s32 0, %v423_v19  ;;  %v432_v21 = vsub.s32 2, %v423_v19 }
  0x16   : > { %651 = vmatprep.subr.bf16.mxu1 %v1358_v23  ;;  %v1381_v51 = vld [vmem:[%s1745_s5 + $0xc0] sm:$0xff]   ;;  %v1391_v61 = vld [vmem:[%s1745_s5 + $0x90] sm:$0xff]   ;;  %v1393_v63 = vld [vmem:[%s1745_s5 + $0xd8] sm:$0xff]   ;;  %v428_v23 = vsub.s32 1, %v423_v19 }
  0x17   : > { %v1382_v52 = vld [vmem:[%s1745_s5] sm:$0xff]   ;;  %v1394_v0 = vld [vmem:[%s1745_s5 + $0x18] sm:$0xff]   ;;  %v1402_v8 = vld [vmem:[%s1745_s5 + $0x28] sm:$0xff]  }
  0x18   : > { %611 = vmatpush1.bf16.msra.mxu0 %v1360_v24  ;;  %v1383_v53 = vld [vmem:[%s1745_s5 + $0x80] sm:$0xff]   ;;  %v1403_v9 = vld [vmem:[%s1745_s5 + $0xa8] sm:$0xff]   ;;  %v1404_v10 = vld [vmem:[%s1745_s5 + $0x70] sm:$0xff]   ;;  %v436_v24 = vsub.s32 3, %v423_v19 }
  0x19   : > { %652 = vmatpush1.bf16.msra.mxu1 %v1361_v25  ;;  %612 = vmatprep.subr.bf16.mxu0 %v1362_v26  ;;  %v1396_v2 = vld [vmem:[%s1745_s5 + $0x60] sm:$0xff]   ;;  %v1405_v11 = vld [vmem:[%s1745_s5 + $0xf0] sm:$0xff]   ;;  %v1408_v14 = vld [vmem:[%s1745_s5 + $0x78] sm:$0xff]  }
  0x1a   : > { %653 = vmatprep.subr.bf16.mxu1 %v1364_v27  ;;  %v1397_v3 = vld [vmem:[%s1745_s5 + $0xe0] sm:$0xff]   ;;  %v1406_v12 = vld [vmem:[%s1745_s5 + $0x30] sm:$0xff]   ;;  %v1409_v15 = vld [vmem:[%s1745_s5 + $0xf8] sm:$0xff]  }
  0x1b   : > { %v1407_v13 = vld [vmem:[%s1745_s5 + $0xb0] sm:$0xff]   ;;  %v1410_v16 = vld [vmem:[%s1745_s5 + $0x38] sm:$0xff]   ;;  %v420_v22 = vld [vmem:[%s1744_s4] sm:$0xf] }
  0x1c   : > { %613 = vmatpush1.bf16.msra.mxu0 %v1366_v28  ;;  %v1411_v17 = vld [vmem:[%s1745_s5 + $0xb8] sm:$0xff]   ;;  %v425_v25 = vrot.slane %v420_v22, %v424_v20  ;;  %v433_v26 = vrot.slane %v420_v22, %v432_v21  ;;  %v429_v27 = vrot.slane %v420_v22, %v428_v23  ;;  %v437_v28 = vrot.slane %v420_v22, %v436_v24  ;;  %v1075_v20 = vld [vmem:[%s1513_s8] sm:$0xf]  ;;  %s348_s8 = scalar_lea.vmem %s1747_s7, %s1192_s28 }
  0x1d   : > { %654 = vmatpush1.bf16.msra.mxu1 %v1367_v29  ;;  %614 = vmatprep.subr.bf16.mxu0 %v1368_v30 }
  0x1e   : > { %655 = vmatprep.subr.bf16.mxu1 %v1370_v31 }
  0x20   : > { %615 = vmatpush1.bf16.msra.mxu0 %v1372_v32 }
  0x21   : > { %656 = vmatpush1.bf16.msra.mxu1 %v1373_v33  ;;  %616 = vmatprep.subr.bf16.mxu0 %v1374_v34 }
  0x22   : > { %657 = vmatprep.subr.bf16.mxu1 %v1376_v35 }
  0x24   : > { %617 = vmatpush1.bf16.msra.mxu0 %v1378_v36 }
  0x25   : > { %658 = vmatpush1.bf16.msra.mxu1 %v1379_v37  ;;  %1263 = vmatprep.subr.bf16.mxu0 %v1380_v50 }
  0x26   : > { %1285 = vmatprep.subr.bf16.mxu1 %v1381_v51 }
  0xa1   : > { %v357_v4 = vpop.xlane.xlu0 %356 }
  0xa2   : > { %v359_v5 = vmul.f32 0.0078125, %v357_v4  ;;  %v1398_v4 = vld [vmem:[%s1745_s5 + $0x20] sm:$0xff]  }
  0xa4   : > { %v1522_v6 = vsub.f32 %v355_v1, %v359_v5  ;;  %v1395_v1 = vld [vmem:[%s1745_s5 + $0x98] sm:$0xff]   ;;  %v1399_v5 = vld [vmem:[%s1745_s5 + $0xa0] sm:$0xff]  }
  0xa6   : > { %v361_v7 = vmul.f32 %v1522_v6, %v1522_v6 }
  0xa8   : > { %362 = vadd.xlane.f32.xlu0 %v361_v7  ;;  %v1401_v7 = vld [vmem:[%s1745_s5 + $0xe8] sm:$0xff]  }
 0x135   : > { %v363_v39 = vpop.xlane.xlu0 %362 }
 0x136   : > { %v364_v40 = vmul.f32 0.0078125, %v363_v39 }
 0x138   : > { %v365_v41 = vadd.f32 1e-05, %v364_v40 }
 0x13a   : > { %1412 = vrsqrt.f32 %v365_v41 }
 0x144   : > { %v1413_v42 = vpop.eup %1412 }
 0x145   : > { %v367_v44 = vmul.f32 %v1413_v42, %v1522_v6  ;;  %v1400_v6 = vld [vmem:[%s1745_s5 + $0x68] sm:$0xff]  }
 0x147   : > { %v375_v46 = vmul.f32 %v1194_v43, %v367_v44 }
 0x149   : > { %v383_v47 = vadd.f32 %v1195_v45, %v375_v46 }
 0x14b   : > { %v384_v48 = vpack.c.bf16 %v383_v47, %v383_v47 }
 0x14d   : > { %385 = vst [vmem:[#allocation2] sm:$0xf] %v384_v48 }
 0x154   : > { %v387_v49 = vld [vmem:[#allocation2] sm:$0xf] }
 0x155   : > { %635 = vmatmul.mubr.bf16.vlgmr.msra.gmra.mrb[0].mxu0 %v387_v49  ;;  %676 = vmatmul.mubr.bf16.vlgmr.msra.gmra.mrb[0].mxu1 %v387_v49 }
 0x156   : > { %1264 = vmatpush3.bf16.msra.mxu0 %v1382_v52  ;;  %1286 = vmatpush3.bf16.msra.mxu1 %v1383_v53 }
 0x157   : > { %1265 = vmatprep.subr.bf16.mxu0 %v1384_v54  ;;  %1287 = vmatprep.subr.bf16.mxu1 %v1385_v55 }
 0x15a   : > { %1266 = vmatpush3.bf16.msra.mxu0 %v1386_v56  ;;  %1288 = vmatpush3.bf16.msra.mxu1 %v1387_v57 }
 0x15b   : > { %1267 = vmatprep.subr.bf16.mxu0 %v1388_v58  ;;  %1289 = vmatprep.subr.bf16.mxu1 %v1389_v59 }
 0x15e   : > { %1268 = vmatpush3.bf16.msra.mxu0 %v1390_v60  ;;  %1290 = vmatpush3.bf16.msra.mxu1 %v1391_v61 }
 0x15f   : > { %1269 = vmatprep.subr.bf16.mxu0 %v1392_v62  ;;  %1291 = vmatprep.subr.bf16.mxu1 %v1393_v63 }
 0x162   : > { %1270 = vmatpush3.bf16.msra.mxu0 %v1394_v0  ;;  %1292 = vmatpush3.bf16.msra.mxu1 %v1395_v1 }
 0x163   : > { %1271 = vmatprep.subr.bf16.mxu0 %v1396_v2  ;;  %1293 = vmatprep.subr.bf16.mxu1 %v1397_v3 }
 0x166   : > { %1272 = vmatpush3.bf16.msra.mxu0 %v1398_v4  ;;  %1294 = vmatpush3.bf16.msra.mxu1 %v1399_v5 }
 0x167   : > { %1273 = vmatprep.subr.bf16.mxu0 %v1400_v6  ;;  %1295 = vmatprep.subr.bf16.mxu1 %v1401_v7 }
 0x16a   : > { %1274 = vmatpush3.bf16.msra.mxu0 %v1402_v8  ;;  %1296 = vmatpush3.bf16.msra.mxu1 %v1403_v9 }
 0x16b   : > { %1275 = vmatprep.subr.bf16.mxu0 %v1404_v10  ;;  %1297 = vmatprep.subr.bf16.mxu1 %v1405_v11 }
 0x16e   : > { %1276 = vmatpush3.bf16.msra.mxu0 %v1406_v12  ;;  %1298 = vmatpush3.bf16.msra.mxu1 %v1407_v13 }
 0x16f   : > { %1277 = vmatprep.subr.bf16.mxu0 %v1408_v14  ;;  %1299 = vmatprep.subr.bf16.mxu1 %v1409_v15 }
 0x172   : > { %1278 = vmatpush3.bf16.msra.mxu0 %v1410_v16  ;;  %1300 = vmatpush3.bf16.msra.mxu1 %v1411_v17 }
 0x228   : > { %v636_v29 = vpop.f32.mrb[0].mxu0  ;;  %v677_v30 = vpop.f32.mrb[0].mxu1 }
 0x229   : > { %v637_v31 = vadd.f32 %v636_v29, %v425_v25  ;;  %v678_v32 = vadd.f32 %v677_v30, %v433_v26  ;;  %v638_v33 = vpop.f32.mrb[1].mxu0  ;;  %v679_v34 = vpop.f32.mrb[1].mxu1  ;;  %v1076_v29 = vunpack.c.l.bf16 %v1075_v20 }
 0x22a   : > { %v639_v35 = vadd.f32 %v638_v33, %v429_v27  ;;  %v680_v36 = vadd.f32 %v679_v34, %v437_v28  ;;  %v640_v37 = vpop.f32.mrb[2].mxu0  ;;  %v681_v38 = vpop.f32.mrb[2].mxu1  ;;  %v1260_v27 = vld [vmem:[%s1746_s6] ss:$0 sm:$0xff] }
 0x22b   : > { %v688_v39 = vmul.f32 %v637_v31, %v637_v31  ;;  %v690_v40 = vmul.f32 %v678_v32, %v678_v32  ;;  %v641_v41 = vpop.f32.mrb[3].mxu0  ;;  %v682_v42 = vpop.f32.mrb[3].mxu1  ;;  %v684_v1 = vmul.f32 0.5, %v637_v31  ;;  %v686_v4 = vmul.f32 0.5, %v678_v32 }
 0x22c   : > { %v689_v43 = vmul.f32 %v639_v35, %v639_v35  ;;  %v691_v44 = vmul.f32 %v680_v36, %v680_v36  ;;  %v685_v5 = vmul.f32 0.5, %v639_v35  ;;  %v687_v7 = vmul.f32 0.5, %v680_v36 }
 0x22d   : > { %v692_v45 = vmul.f32 %v688_v39, %v637_v31  ;;  %v694_v46 = vmul.f32 %v690_v40, %v678_v32 }
 0x22e   : > { %v693_v47 = vmul.f32 %v689_v43, %v639_v35  ;;  %v695_v48 = vmul.f32 %v691_v44, %v680_v36 }
 0x22f   : > { %v696_v49 = vmul.f32 0.044715, %v692_v45  ;;  %v698_v50 = vmul.f32 0.044715, %v694_v46 }
 0x230   : > { %v697_v51 = vmul.f32 0.044715, %v693_v47  ;;  %v699_v52 = vmul.f32 0.044715, %v695_v48 }
 0x231   : > { %v700_v53 = vadd.f32 %v696_v49, %v637_v31  ;;  %v702_v54 = vadd.f32 %v698_v50, %v678_v32 }
 0x232   : > { %v701_v55 = vadd.f32 %v697_v51, %v639_v35  ;;  %v703_v56 = vadd.f32 %v699_v52, %v680_v36 }
 0x233   : > { %v704_v57 = vmul.f32 0.7978846, %v700_v53  ;;  %v706_v58 = vmul.f32 0.7978846, %v702_v54 }
 0x234   : > { %v705_v59 = vmul.f32 0.7978846, %v701_v55  ;;  %v707_v60 = vmul.f32 0.7978846, %v703_v56 }
 0x235   : > { %1414 = vtanh.f32 %v704_v57 }
 0x236   : > { %1416 = vtanh.f32 %v706_v58 }
 0x237   : > { %1418 = vtanh.f32 %v705_v59 }
 0x238   : > { %1420 = vtanh.f32 %v707_v60 }
 0x23f   : > { %v1415_v61 = vpop.eup %1414 }
 0x240   : > { %v1417_v62 = vpop.eup %1416  ;;  %v712_v63 = vadd.f32 1.0, %v1415_v61 }
 0x241   : > { %v1419_v0 = vpop.eup %1418  ;;  %v714_v2 = vadd.f32 1.0, %v1417_v62 }
 0x242   : > { %v1421_v3 = vpop.eup %1420  ;;  %v713_v6 = vadd.f32 1.0, %v1419_v0  ;;  %v716_v9 = vmul.f32 %v712_v63, %v684_v1 }
 0x243   : > { %v715_v8 = vadd.f32 1.0, %v1421_v3  ;;  %v718_v11 = vmul.f32 %v714_v2, %v686_v4 }
 0x244   : > { %v717_v10 = vmul.f32 %v713_v6, %v685_v5  ;;  %v721_v15 = vpack.c.bf16 %v716_v9, %v716_v9 }
 0x245   : > { %v719_v12 = vmul.f32 %v715_v8, %v687_v7  ;;  %v723_v16 = vpack.c.bf16 %v718_v11, %v718_v11 }
 0x246   : > { %v722_v13 = vpack.c.bf16 %v717_v10, %v717_v10 }
 0x247   : > { %v724_v14 = vpack.c.bf16 %v719_v12, %v719_v12 }
 0x248   : > { %1013 = vmatprep.mubr.bf16.mxu0 %v722_v13 }
 0x249   : > { %1053 = vmatprep.mubr.bf16.mxu1 %v724_v14  ;;  %1014 = vmatmul.mubr.bf16.vlgmr.msra.gmra.mrb[4].mxu0 %v721_v15 }
 0x24a   : > { %1054 = vmatmul.mubr.bf16.vlgmr.msra.gmra.mrb[4].mxu1 %v723_v16 }
 0x31c   : > { %v1279_v17 = vpop.f32.mrb[4].mxu0 }
 0x31d   : > { %v1301_v18 = vpop.f32.mrb[4].mxu1  ;;  %v1280_v19 = vpop.f32.mrb[5].mxu0 }
 0x31e   : > { %v1281_v21 = vadd.f32 %v1280_v19, %v1279_v17  ;;  %v1302_v22 = vpop.f32.mrb[5].mxu1  ;;  %v1282_v23 = vpop.f32.mrb[6].mxu0 }
 0x31f   : > { %v1303_v24 = vadd.f32 %v1302_v22, %v1301_v18  ;;  %v1304_v25 = vpop.f32.mrb[6].mxu1  ;;  %v1283_v26 = vpop.f32.mrb[7].mxu0 }
 0x320   : > { %v1305_v28 = vpop.f32.mrb[7].mxu1 }
 0x321   : > { %v1056_v30 = vadd.f32 %v1303_v24, %v1281_v21 }
 0x323   : > { %v1074_v31 = vadd.f32 %v1260_v27, %v1056_v30 }
 0x325   : > { %v1077_v32 = vadd.f32 %v1076_v29, %v1074_v31 }
 0x327   : > { %v1078_v33 = vpack.c.bf16 %v1077_v32, %v1077_v32 }
 0x329   : > { %1079 = vst [vmem:[%s348_s8] sm:$0xf] %v1078_v33 }
 0x32a PF: > { %s17_s26 = sadd.s32 1, %s1444_s26   ;;  %s1748_s24 = smov %s1440_s25 }
 0x32b   : > { %p14_p5 = scmp.ge.s32.totalorder %s17_s26, 4   ;;  %s1749_s25 = smov %s1751_s27 }
 0x32d   :  { %16 = sbr.rel (!%p14_p5) target bundleno = 2 (0x2), region = 95 }

</bundles_post_ra>
